<compile_context>
chip_gen: v6e
topology: v6e:2x2x1
jax: 0.10.0
libtpu: 0.0.40
codegen_flags: <defaults>
</compile_context>

<pallas_src>
import math
import functools

import jax
import jax.numpy as jnp
from jax.experimental import pallas as pl
from jax.experimental.pallas import tpu as pltpu


# ----------------------------- helpers --------------------------------------

def _row_tile(M, max_tile=256):
    """Largest multiple-of-8 row tile that divides M (<= max_tile), preferring >=2 grid steps."""
    if M % 8 != 0:
        return M
    best, t = 8, 8
    while t <= min(max_tile, M):
        if M % t == 0:
            best = t
        t += 8
    if best == M and M > 8 and (M // 2) % 8 == 0:
        best = M // 2            # give v7x's second TensorCore something to do
    return best


# ----------------------------- Pallas kernels -------------------------------

def _mha_sublayer_kernel(xq_ref, xkv_ref, wq_ref, bq_ref, wkv_ref, bkv_ref,
                         wo_ref, bo_ref, g_ref, b_ref, o_ref,
                         *, num_heads, causal, eps):
    """Fused: QKV proj -> per-head softmax attention -> out proj -> +resid -> LayerNorm."""
    xq = xq_ref[0]                       # (Sq, D) f32
    xkv = xkv_ref[0]                     # (Sk, D) f32
    Sq, D = xq.shape
    Sk = xkv.shape[0]
    dk = D // num_heads
    scale = 1.0 / math.sqrt(dk)

    # Fused projections (bf16 MXU inputs, f32 accumulation).
    q = jnp.dot(xq.astype(jnp.bfloat16), wq_ref[...],
                preferred_element_type=jnp.float32) + bq_ref[...]        # (Sq, D)
    kv = jnp.dot(xkv.astype(jnp.bfloat16), wkv_ref[...],
                 preferred_element_type=jnp.float32) + bkv_ref[...]      # (Sk, 2D)
    k = kv[:, :D]
    v = kv[:, D:]

    if causal:
        row = jax.lax.broadcasted_iota(jnp.int32, (Sq, Sk), 0)
        col = jax.lax.broadcasted_iota(jnp.int32, (Sq, Sk), 1)
        neg = jnp.where(col > row, -1e9, 0.0).astype(jnp.float32)

    # Per-head attention, all VMEM-resident; unrolled static loop over heads.
    head_outs = []
    for h in range(num_heads):
        qh = q[:, h * dk:(h + 1) * dk]
        kh = k[:, h * dk:(h + 1) * dk]
        vh = v[:, h * dk:(h + 1) * dk]
        s = jax.lax.dot_general(qh.astype(jnp.bfloat16), kh.astype(jnp.bfloat16),
                                (((1,), (1,)), ((), ())),
                                preferred_element_type=jnp.float32) * scale
        if causal:
            s = s + neg
        s = s - jnp.max(s, axis=-1, keepdims=True)
        p = jnp.exp(s)                                                    # f32 softmax
        p = p * pl.reciprocal(jnp.sum(p, axis=-1, keepdims=True), approx=True)
        head_outs.append(jnp.dot(p.astype(jnp.bfloat16), vh.astype(jnp.bfloat16),
                                 preferred_element_type=jnp.float32))
    attn = jnp.concatenate(head_outs, axis=-1)                            # (Sq, D) lane-dense

    # Output projection + residual + post-norm LayerNorm (f32 statistics).
    y = jnp.dot(attn.astype(jnp.bfloat16), wo_ref[...],
                preferred_element_type=jnp.float32) + bo_ref[...] + xq
    mean = jnp.mean(y, axis=-1, keepdims=True)
    var = jnp.mean(jnp.square(y - mean), axis=-1, keepdims=True)
    norm = (y - mean) * jax.lax.rsqrt(var + eps)
    o_ref[0] = (norm * g_ref[...] + b_ref[...]).astype(o_ref.dtype)


def _ffn_sublayer_kernel(x_ref, w1_ref, b1_ref, w2_ref, b2_ref, g_ref, b_ref, o_ref, *, eps):
    """Fused: ReLU(x@w1+b1)@w2+b2 + residual -> LayerNorm; hidden stays in VMEM."""
    x = x_ref[...]                                                        # (tm, D) f32
    h = jnp.dot(x.astype(jnp.bfloat16), w1_ref[...],
                preferred_element_type=jnp.float32) + b1_ref[...]
    h = jnp.maximum(h, 0.0)
    y = jnp.dot(h.astype(jnp.bfloat16), w2_ref[...],
                preferred_element_type=jnp.float32) + b2_ref[...] + x
    mean = jnp.mean(y, axis=-1, keepdims=True)
    var = jnp.mean(jnp.square(y - mean), axis=-1, keepdims=True)
    norm = (y - mean) * jax.lax.rsqrt(var + eps)
    o_ref[...] = (norm * g_ref[...] + b_ref[...]).astype(o_ref.dtype)


def _out_proj_kernel(x_ref, w_ref, b_ref, o_ref):
    o_ref[...] = (jnp.dot(x_ref[...].astype(jnp.bfloat16), w_ref[...],
                          preferred_element_type=jnp.float32)
                  + b_ref[...]).astype(o_ref.dtype)


# ----------------------------- kernel wrappers -------------------------------

def mha_sublayer(x_q, x_kv, ap, ln_g, ln_b, num_heads, causal):
    """x_q: (B, Sq, D), x_kv: (B, Sk, D) -> LayerNorm(x_q + MHA(x_q, x_kv))."""
    B, Sq, D = x_q.shape
    Sk = x_kv.shape[1]
    kernel = functools.partial(_mha_sublayer_kernel,
                               num_heads=num_heads, causal=causal, eps=1e-5)
    return pl.pallas_call(
        kernel,
        out_shape=jax.ShapeDtypeStruct((B, Sq, D), jnp.float32),
        grid=(B,),
        in_specs=[
            pl.BlockSpec((1, Sq, D), lambda i: (i, 0, 0)),    # x_q
            pl.BlockSpec((1, Sk, D), lambda i: (i, 0, 0)),    # x_kv
            pl.BlockSpec((D, D), lambda i: (0, 0)),           # wq  (bf16)
            pl.BlockSpec((1, D), lambda i: (0, 0)),           # bq
            pl.BlockSpec((D, 2 * D), lambda i: (0, 0)),       # wkv (bf16, K|V fused)
            pl.BlockSpec((1, 2 * D), lambda i: (0, 0)),       # bkv
            pl.BlockSpec((D, D), lambda i: (0, 0)),           # wo  (bf16)
            pl.BlockSpec((1, D), lambda i: (0, 0)),           # bo
            pl.BlockSpec((1, D), lambda i: (0, 0)),           # ln gamma
            pl.BlockSpec((1, D), lambda i: (0, 0)),           # ln beta
        ],
        out_specs=pl.BlockSpec((1, Sq, D), lambda i: (i, 0, 0)),
        compiler_params=pltpu.CompilerParams(dimension_semantics=("parallel",)),
    )(x_q, x_kv, ap["wq"], ap["bq"], ap["wkv"], ap["bkv"],
      ap["wo"], ap["bo"], ln_g, ln_b)


def ffn_sublayer(x, fp, ln_g, ln_b):
    """x: (B, S, D) -> LayerNorm(x + FFN(x))."""
    B, S, D = x.shape
    M = B * S
    F = fp["w1"].shape[1]
    tm = _row_tile(M)
    kernel = functools.partial(_ffn_sublayer_kernel, eps=1e-5)
    out = pl.pallas_call(
        kernel,
        out_shape=jax.ShapeDtypeStruct((M, D), jnp.float32),
        grid=(M // tm,),
        in_specs=[
            pl.BlockSpec((tm, D), lambda i: (i, 0)),
            pl.BlockSpec((D, F), lambda i: (0, 0)),
            pl.BlockSpec((1, F), lambda i: (0, 0)),
            pl.BlockSpec((F, D), lambda i: (0, 0)),
            pl.BlockSpec((1, D), lambda i: (0, 0)),
            pl.BlockSpec((1, D), lambda i: (0, 0)),
            pl.BlockSpec((1, D), lambda i: (0, 0)),
        ],
        out_specs=pl.BlockSpec((tm, D), lambda i: (i, 0)),
        compiler_params=pltpu.CompilerParams(dimension_semantics=("parallel",)),
    )(x.reshape(M, D), fp["w1"], fp["b1"], fp["w2"], fp["b2"], ln_g, ln_b)
    return out.reshape(B, S, D)


def output_projection(x, w, b):
    """x: (M, D), w: (D, Vp) padded to a 128 multiple, b: (1, Vp) -> (M, Vp)."""
    M, D = x.shape
    Vp = w.shape[1]
    tm = _row_tile(M)
    tn = 128 if Vp % 128 == 0 else Vp
    # TODO(synk): add a K-tiled f32 accumulator (pattern P1+P3) once d_model no longer
    # fits in a single VMEM block; at toy sizes K=D fits whole.
    return pl.pallas_call(
        _out_proj_kernel,
        out_shape=jax.ShapeDtypeStruct((M, Vp), jnp.float32),
        grid=(M // tm, Vp // tn),
        in_specs=[
            pl.BlockSpec((tm, D), lambda i, j: (i, 0)),
            pl.BlockSpec((D, tn), lambda i, j: (0, j)),
            pl.BlockSpec((1, tn), lambda i, j: (0, j)),
        ],
        out_specs=pl.BlockSpec((tm, tn), lambda i, j: (i, j)),
        compiler_params=pltpu.CompilerParams(
            dimension_semantics=("parallel", "parallel")),
    )(x, w, b)


# ------------------------------ model glue ----------------------------------

def transformer_forward(params, src, tgt, *, num_heads, d_model, tgt_vocab):
    B, Ss = src.shape
    St = tgt.shape[1]
    scale = math.sqrt(d_model)
    # Embedding gathers + scale + PE add are plain JAX (XLA fuses; no kernel launch).
    # TODO(synk): dropout layers are identity here (inference / eval semantics).
    x = params["enc_emb"][src] * scale + params["pe"][:Ss][None, :, :]
    for lp in params["encoder"]:
        x = mha_sublayer(x, x, lp["attn"], lp["ln1_g"], lp["ln1_b"],
                         num_heads, causal=False)          # src_mask=None
        x = ffn_sublayer(x, lp["ff"], lp["ln2_g"], lp["ln2_b"])
    enc = x

    y = params["dec_emb"][tgt] * scale + params["pe"][:St][None, :, :]
    for lp in params["decoder"]:
        y = mha_sublayer(y, y, lp["self_attn"], lp["ln1_g"], lp["ln1_b"],
                         num_heads, causal=True)            # causal tgt_mask
        y = mha_sublayer(y, enc, lp["cross_attn"], lp["ln2_g"], lp["ln2_b"],
                         num_heads, causal=False)           # no cross mask
        y = ffn_sublayer(y, lp["ff"], lp["ln3_g"], lp["ln3_b"])

    logits_p = output_projection(y.reshape(B * St, d_model),
                                 params["w_out"], params["b_out"])
    return logits_p[:, :tgt_vocab].reshape(B, St, tgt_vocab)


# --------------------------- parameter creation ------------------------------

def xavier(key, shape):
    fan_in, fan_out = shape
    a = math.sqrt(6.0 / (fan_in + fan_out))
    return jax.random.uniform(key, shape, jnp.float32, -a, a)


def make_attn_params(key, d_model):
    ks = jax.random.split(key, 4)
    wq = xavier(ks[0], (d_model, d_model))
    wk = xavier(ks[1], (d_model, d_model))
    wv = xavier(ks[2], (d_model, d_model))
    wo = xavier(ks[3], (d_model, d_model))
    z = jnp.zeros((1, d_model), jnp.float32)
    return {
        "wq": wq.astype(jnp.bfloat16), "bq": z,
        "wkv": jnp.concatenate([wk, wv], axis=1).astype(jnp.bfloat16),
        "bkv": jnp.zeros((1, 2 * d_model), jnp.float32),
        "wo": wo.astype(jnp.bfloat16), "bo": z,
    }


def make_ff_params(key, d_model, d_ff):
    k1, k2 = jax.random.split(key)
    return {
        "w1": xavier(k1, (d_model, d_ff)).astype(jnp.bfloat16),
        "b1": jnp.zeros((1, d_ff), jnp.float32),
        "w2": xavier(k2, (d_ff, d_model)).astype(jnp.bfloat16),
        "b2": jnp.zeros((1, d_model), jnp.float32),
    }


def make_positional_encoding(max_len, d_model):
    pos = jnp.arange(max_len, dtype=jnp.float32)[:, None]
    div = jnp.exp(jnp.arange(0, d_model, 2, dtype=jnp.float32)
                  * (-math.log(10000.0) / d_model))
    pe = jnp.zeros((max_len, d_model), jnp.float32)
    pe = pe.at[:, 0::2].set(jnp.sin(pos * div))
    pe = pe.at[:, 1::2].set(jnp.cos(pos * div))
    return pe


def make_params(key, src_vocab, tgt_vocab, d_model, num_layers, d_ff, max_len):
    keys = jax.random.split(key, 8 * num_layers + 8)
    ki = iter(keys)
    ones = jnp.ones((1, d_model), jnp.float32)
    zeros = jnp.zeros((1, d_model), jnp.float32)

    vocab_pad = pl.cdiv(tgt_vocab, 128) * 128        # lane-dense final projection
    w_out = xavier(next(ki), (d_model, tgt_vocab))
    w_out = jnp.pad(w_out, ((0, 0), (0, vocab_pad - tgt_vocab)))

    params = {
        "enc_emb": xavier(next(ki), (src_vocab, d_model)),
        "dec_emb": xavier(next(ki), (tgt_vocab, d_model)),
        "pe": make_positional_encoding(max_len, d_model),
        "w_out": w_out.astype(jnp.bfloat16),
        "b_out": jnp.zeros((1, vocab_pad), jnp.float32),
        "encoder": [],
        "decoder": [],
    }
    for _ in range(num_layers):
        params["encoder"].append({
            "attn": make_attn_params(next(ki), d_model),
            "ff": make_ff_params(next(ki), d_model, d_ff),
            "ln1_g": ones, "ln1_b": zeros,
            "ln2_g": ones, "ln2_b": zeros,
        })
    for _ in range(num_layers):
        params["decoder"].append({
            "self_attn": make_attn_params(next(ki), d_model),
            "cross_attn": make_attn_params(next(ki), d_model),
            "ff": make_ff_params(next(ki), d_model, d_ff),
            "ln1_g": ones, "ln1_b": zeros,
            "ln2_g": ones, "ln2_b": zeros,
            "ln3_g": ones, "ln3_b": zeros,
        })
    return params


# ---------------------------------- main -------------------------------------

if __name__ == "__main__":
    # Small shapes consistent with the module's forward.
    SRC_VOCAB, TGT_VOCAB = 32, 40
    D_MODEL, NUM_HEADS, NUM_LAYERS, D_FF = 32, 4, 2, 64
    B, S_SRC, S_TGT, MAX_LEN = 2, 8, 8, 64

    root = jax.random.PRNGKey(0)
    kp, ks, kt = jax.random.split(root, 3)
    params = make_params(kp, SRC_VOCAB, TGT_VOCAB, D_MODEL, NUM_LAYERS, D_FF, MAX_LEN)
    src = jax.random.randint(ks, (B, S_SRC), 0, SRC_VOCAB, dtype=jnp.int32)
    tgt = jax.random.randint(kt, (B, S_TGT), 0, TGT_VOCAB, dtype=jnp.int32)

    fwd = jax.jit(functools.partial(transformer_forward,
                                    num_heads=NUM_HEADS, d_model=D_MODEL,
                                    tgt_vocab=TGT_VOCAB))
    out = fwd(params, src, tgt)
    jax.block_until_ready(out)
    assert out.shape == (B, S_TGT, TGT_VOCAB), out.shape
    assert jnp.all(jnp.isfinite(out))
    print("KERNEL_OK")
</pallas_src>

<mosaic_0001>
module attributes {stable_mosaic.version = 11 : i64} {
  func.func @_ffn_sublayer_kernel(%arg0: i32, %arg1: memref<8x32xf32, #tpu.memory_space<vmem>>, %arg2: memref<32x64xbf16, #tpu.memory_space<vmem>>, %arg3: memref<1x64xf32, #tpu.memory_space<vmem>>, %arg4: memref<64x32xbf16, #tpu.memory_space<vmem>>, %arg5: memref<1x32xf32, #tpu.memory_space<vmem>>, %arg6: memref<1x32xf32, #tpu.memory_space<vmem>>, %arg7: memref<1x32xf32, #tpu.memory_space<vmem>>, %arg8: memref<8x32xf32, #tpu.memory_space<vmem>>) attributes {dimension_semantics = [#tpu.dimension_semantics<parallel>], iteration_bounds = array<i64: 2>, scalar_prefetch = 0 : i64, scratch_operands = 0 : i64, tpu.core_type = #tpu.core_type<tc>, window_params = [{transform_indices = @transform_0, window_bounds = array<i64: 8, 32>}, {pipeline_mode = #tpu.pipeline_mode<synchronous>, transform_indices = @transform_1, window_bounds = array<i64: 32, 64>}, {pipeline_mode = #tpu.pipeline_mode<synchronous>, transform_indices = @transform_2, window_bounds = array<i64: 1, 64>}, {pipeline_mode = #tpu.pipeline_mode<synchronous>, transform_indices = @transform_3, window_bounds = array<i64: 64, 32>}, {pipeline_mode = #tpu.pipeline_mode<synchronous>, transform_indices = @transform_4, window_bounds = array<i64: 1, 32>}, {pipeline_mode = #tpu.pipeline_mode<synchronous>, transform_indices = @transform_5, window_bounds = array<i64: 1, 32>}, {pipeline_mode = #tpu.pipeline_mode<synchronous>, transform_indices = @transform_6, window_bounds = array<i64: 1, 32>}, {transform_indices = @transform_7, window_bounds = array<i64: 8, 32>}]} {
    %c0 = arith.constant 0 : index
    %c0_0 = arith.constant 0 : index
    %0 = vector.load %arg1[%c0, %c0_0] : memref<8x32xf32, #tpu.memory_space<vmem>>, vector<8x32xf32>
    %1 = arith.truncf %0 : vector<8x32xf32> to vector<8x32xbf16>
    %c0_1 = arith.constant 0 : index
    %c0_2 = arith.constant 0 : index
    %2 = vector.load %arg2[%c0_1, %c0_2] : memref<32x64xbf16, #tpu.memory_space<vmem>>, vector<32x64xbf16>
    %cst = arith.constant dense<0.000000e+00> : vector<8x64xf32>
    %3 = tpu.matmul %1, %2, %cst {dimension_numbers = #tpu.dot_dimension_numbers<[1], [0], [0], [1], [0, 0, 1, 1], [], []>} : vector<8x32xbf16>, vector<32x64xbf16>, vector<8x64xf32> -> vector<8x64xf32>
    %c0_3 = arith.constant 0 : index
    %c0_4 = arith.constant 0 : index
    %4 = vector.load %arg3[%c0_3, %c0_4] : memref<1x64xf32, #tpu.memory_space<vmem>>, vector<1x64xf32>
    %5 = vector.broadcast %4 : vector<1x64xf32> to vector<8x64xf32>
    %6 = arith.addf %3, %5 : vector<8x64xf32>
    %cst_5 = arith.constant 0.000000e+00 : f32
    %7 = vector.broadcast %cst_5 : f32 to vector<8x64xf32>
    %8 = arith.maximumf %6, %7 : vector<8x64xf32>
    %9 = arith.truncf %8 : vector<8x64xf32> to vector<8x64xbf16>
    %c0_6 = arith.constant 0 : index
    %c0_7 = arith.constant 0 : index
    %10 = vector.load %arg4[%c0_6, %c0_7] : memref<64x32xbf16, #tpu.memory_space<vmem>>, vector<64x32xbf16>
    %cst_8 = arith.constant dense<0.000000e+00> : vector<8x32xf32>
    %11 = tpu.matmul %9, %10, %cst_8 {dimension_numbers = #tpu.dot_dimension_numbers<[1], [0], [0], [1], [0, 0, 1, 1], [], []>} : vector<8x64xbf16>, vector<64x32xbf16>, vector<8x32xf32> -> vector<8x32xf32>
    %c0_9 = arith.constant 0 : index
    %c0_10 = arith.constant 0 : index
    %12 = vector.load %arg5[%c0_9, %c0_10] : memref<1x32xf32, #tpu.memory_space<vmem>>, vector<1x32xf32>
    %13 = vector.broadcast %12 : vector<1x32xf32> to vector<8x32xf32>
    %14 = arith.addf %11, %13 : vector<8x32xf32>
    %15 = arith.addf %14, %0 : vector<8x32xf32>
    %cst_11 = arith.constant dense<0.000000e+00> : vector<8xf32>
    %16 = vector.multi_reduction <add>, %15, %cst_11 [1] : vector<8x32xf32> to vector<8xf32>
    %17 = vector.shape_cast %16 : vector<8xf32> to vector<8x1xf32>
    %cst_12 = arith.constant 3.200000e+01 : f32
    %18 = vector.broadcast %cst_12 : f32 to vector<8x1xf32>
    %19 = arith.divf %17, %18 : vector<8x1xf32>
    %20 = vector.broadcast %19 : vector<8x1xf32> to vector<8x32xf32>
    %21 = arith.subf %15, %20 : vector<8x32xf32>
    %22 = arith.mulf %21, %21 : vector<8x32xf32>
    %cst_13 = arith.constant dense<0.000000e+00> : vector<8xf32>
    %23 = vector.multi_reduction <add>, %22, %cst_13 [1] : vector<8x32xf32> to vector<8xf32>
    %24 = vector.shape_cast %23 : vector<8xf32> to vector<8x1xf32>
    %cst_14 = arith.constant 3.200000e+01 : f32
    %25 = vector.broadcast %cst_14 : f32 to vector<8x1xf32>
    %26 = arith.divf %24, %25 : vector<8x1xf32>
    %27 = vector.broadcast %19 : vector<8x1xf32> to vector<8x32xf32>
    %28 = arith.subf %15, %27 : vector<8x32xf32>
    %cst_15 = arith.constant 9.99999974E-6 : f32
    %29 = vector.broadcast %cst_15 : f32 to vector<8x1xf32>
    %30 = arith.addf %26, %29 : vector<8x1xf32>
    %31 = math.rsqrt %30 : vector<8x1xf32>
    %32 = vector.broadcast %31 : vector<8x1xf32> to vector<8x32xf32>
    %33 = arith.mulf %28, %32 : vector<8x32xf32>
    %c0_16 = arith.constant 0 : index
    %c0_17 = arith.constant 0 : index
    %34 = vector.load %arg6[%c0_16, %c0_17] : memref<1x32xf32, #tpu.memory_space<vmem>>, vector<1x32xf32>
    %35 = vector.broadcast %34 : vector<1x32xf32> to vector<8x32xf32>
    %36 = arith.mulf %33, %35 : vector<8x32xf32>
    %c0_18 = arith.constant 0 : index
    %c0_19 = arith.constant 0 : index
    %37 = vector.load %arg7[%c0_18, %c0_19] : memref<1x32xf32, #tpu.memory_space<vmem>>, vector<1x32xf32>
    %38 = vector.broadcast %37 : vector<1x32xf32> to vector<8x32xf32>
    %39 = arith.addf %36, %38 : vector<8x32xf32>
    %c0_20 = arith.constant 0 : index
    %c0_21 = arith.constant 0 : index
    %40 = vector.load %arg8[%c0_20, %c0_21] : memref<8x32xf32, #tpu.memory_space<vmem>>, vector<8x32xf32>
    tpu.vector_store %arg8[%c0_20, %c0_21], %39 {strides = array<i32>} : memref<8x32xf32, #tpu.memory_space<vmem>>, vector<8x32xf32>,
    return
  }
  func.func @transform_0(%arg0: i32) -> (i32, i32) {
    %c0_i32 = arith.constant 0 : i32
    %c0_i32_0 = arith.constant 0 : i32
    return %arg0, %c0_i32 : i32, i32
  }
  func.func @transform_1(%arg0: i32) -> (i32, i32) {
    %c0_i32 = arith.constant 0 : i32
    %c0_i32_0 = arith.constant 0 : i32
    %c0_i32_1 = arith.constant 0 : i32
    return %c0_i32, %c0_i32_0 : i32, i32
  }
  func.func @transform_2(%arg0: i32) -> (i32, i32) {
    %c0_i32 = arith.constant 0 : i32
    %c0_i32_0 = arith.constant 0 : i32
    %c0_i32_1 = arith.constant 0 : i32
    return %c0_i32, %c0_i32_0 : i32, i32
  }
  func.func @transform_3(%arg0: i32) -> (i32, i32) {
    %c0_i32 = arith.constant 0 : i32
    %c0_i32_0 = arith.constant 0 : i32
    %c0_i32_1 = arith.constant 0 : i32
    return %c0_i32, %c0_i32_0 : i32, i32
  }
  func.func @transform_4(%arg0: i32) -> (i32, i32) {
    %c0_i32 = arith.constant 0 : i32
    %c0_i32_0 = arith.constant 0 : i32
    %c0_i32_1 = arith.constant 0 : i32
    return %c0_i32, %c0_i32_0 : i32, i32
  }
  func.func @transform_5(%arg0: i32) -> (i32, i32) {
    %c0_i32 = arith.constant 0 : i32
    %c0_i32_0 = arith.constant 0 : i32
    %c0_i32_1 = arith.constant 0 : i32
    return %c0_i32, %c0_i32_0 : i32, i32
  }
  func.func @transform_6(%arg0: i32) -> (i32, i32) {
    %c0_i32 = arith.constant 0 : i32
    %c0_i32_0 = arith.constant 0 : i32
    %c0_i32_1 = arith.constant 0 : i32
    return %c0_i32, %c0_i32_0 : i32, i32
  }
  func.func @transform_7(%arg0: i32) -> (i32, i32) {
    %c0_i32 = arith.constant 0 : i32
    %c0_i32_0 = arith.constant 0 : i32
    return %arg0, %c0_i32 : i32, i32
  }
}

module attributes {stable_mosaic.version = 11 : i64} {
  func.func @_mha_sublayer_kernel(%arg0: i32, %arg1: memref<1x8x32xf32, #tpu.memory_space<vmem>>, %arg2: memref<1x8x32xf32, #tpu.memory_space<vmem>>, %arg3: memref<32x32xbf16, #tpu.memory_space<vmem>>, %arg4: memref<1x32xf32, #tpu.memory_space<vmem>>, %arg5: memref<32x64xbf16, #tpu.memory_space<vmem>>, %arg6: memref<1x64xf32, #tpu.memory_space<vmem>>, %arg7: memref<32x32xbf16, #tpu.memory_space<vmem>>, %arg8: memref<1x32xf32, #tpu.memory_space<vmem>>, %arg9: memref<1x32xf32, #tpu.memory_space<vmem>>, %arg10: memref<1x32xf32, #tpu.memory_space<vmem>>, %arg11: memref<1x8x32xf32, #tpu.memory_space<vmem>>) attributes {dimension_semantics = [#tpu.dimension_semantics<parallel>], iteration_bounds = array<i64: 2>, scalar_prefetch = 0 : i64, scratch_operands = 0 : i64, tpu.core_type = #tpu.core_type<tc>, window_params = [{transform_indices = @transform_0, window_bounds = array<i64: 1, 8, 32>}, {transform_indices = @transform_1, window_bounds = array<i64: 1, 8, 32>}, {pipeline_mode = #tpu.pipeline_mode<synchronous>, transform_indices = @transform_2, window_bounds = array<i64: 32, 32>}, {pipeline_mode = #tpu.pipeline_mode<synchronous>, transform_indices = @transform_3, window_bounds = array<i64: 1, 32>}, {pipeline_mode = #tpu.pipeline_mode<synchronous>, transform_indices = @transform_4, window_bounds = array<i64: 32, 64>}, {pipeline_mode = #tpu.pipeline_mode<synchronous>, transform_indices = @transform_5, window_bounds = array<i64: 1, 64>}, {pipeline_mode = #tpu.pipeline_mode<synchronous>, transform_indices = @transform_6, window_bounds = array<i64: 32, 32>}, {pipeline_mode = #tpu.pipeline_mode<synchronous>, transform_indices = @transform_7, window_bounds = array<i64: 1, 32>}, {pipeline_mode = #tpu.pipeline_mode<synchronous>, transform_indices = @transform_8, window_bounds = array<i64: 1, 32>}, {pipeline_mode = #tpu.pipeline_mode<synchronous>, transform_indices = @transform_9, window_bounds = array<i64: 1, 32>}, {transform_indices = @transform_10, window_bounds = array<i64: 1, 8, 32>}]} {
    %c0 = arith.constant 0 : index
    %c0_0 = arith.constant 0 : index
    %c0_1 = arith.constant 0 : index
    %0 = vector.load %arg1[%c0, %c0_0, %c0_1] : memref<1x8x32xf32, #tpu.memory_space<vmem>>, vector<1x8x32xf32>
    %1 = vector.shape_cast %0 : vector<1x8x32xf32> to vector<8x32xf32>
    %c0_2 = arith.constant 0 : index
    %c0_3 = arith.constant 0 : index
    %c0_4 = arith.constant 0 : index
    %2 = vector.load %arg2[%c0_2, %c0_3, %c0_4] : memref<1x8x32xf32, #tpu.memory_space<vmem>>, vector<1x8x32xf32>
    %3 = vector.shape_cast %2 : vector<1x8x32xf32> to vector<8x32xf32>
    %4 = arith.truncf %1 : vector<8x32xf32> to vector<8x32xbf16>
    %c0_5 = arith.constant 0 : index
    %c0_6 = arith.constant 0 : index
    %5 = vector.load %arg3[%c0_5, %c0_6] : memref<32x32xbf16, #tpu.memory_space<vmem>>, vector<32x32xbf16>
    %cst = arith.constant dense<0.000000e+00> : vector<8x32xf32>
    %6 = tpu.matmul %4, %5, %cst {dimension_numbers = #tpu.dot_dimension_numbers<[1], [0], [0], [1], [0, 0, 1, 1], [], []>} : vector<8x32xbf16>, vector<32x32xbf16>, vector<8x32xf32> -> vector<8x32xf32>
    %c0_7 = arith.constant 0 : index
    %c0_8 = arith.constant 0 : index
    %7 = vector.load %arg4[%c0_7, %c0_8] : memref<1x32xf32, #tpu.memory_space<vmem>>, vector<1x32xf32>
    %8 = vector.broadcast %7 : vector<1x32xf32> to vector<8x32xf32>
    %9 = arith.addf %6, %8 : vector<8x32xf32>
    %10 = arith.truncf %3 : vector<8x32xf32> to vector<8x32xbf16>
    %c0_9 = arith.constant 0 : index
    %c0_10 = arith.constant 0 : index
    %11 = vector.load %arg5[%c0_9, %c0_10] : memref<32x64xbf16, #tpu.memory_space<vmem>>, vector<32x64xbf16>
    %cst_11 = arith.constant dense<0.000000e+00> : vector<8x64xf32>
    %12 = tpu.matmul %10, %11, %cst_11 {dimension_numbers = #tpu.dot_dimension_numbers<[1], [0], [0], [1], [0, 0, 1, 1], [], []>} : vector<8x32xbf16>, vector<32x64xbf16>, vector<8x64xf32> -> vector<8x64xf32>
    %c0_12 = arith.constant 0 : index
    %c0_13 = arith.constant 0 : index
    %13 = vector.load %arg6[%c0_12, %c0_13] : memref<1x64xf32, #tpu.memory_space<vmem>>, vector<1x64xf32>
    %14 = vector.broadcast %13 : vector<1x64xf32> to vector<8x64xf32>
    %15 = arith.addf %12, %14 : vector<8x64xf32>
    %16 = vector.extract_strided_slice %15 {offsets = [0, 0], sizes = [8, 32], strides = [1, 1]} : vector<8x64xf32> to vector<8x32xf32>
    %17 = vector.extract_strided_slice %15 {offsets = [0, 32], sizes = [8, 32], strides = [1, 1]} : vector<8x64xf32> to vector<8x32xf32>
    %18 = vector.extract_strided_slice %9 {offsets = [0, 0], sizes = [8, 8], strides = [1, 1]} : vector<8x32xf32> to vector<8x8xf32>
    %19 = vector.extract_strided_slice %16 {offsets = [0, 0], sizes = [8, 8], strides = [1, 1]} : vector<8x32xf32> to vector<8x8xf32>
    %20 = vector.extract_strided_slice %17 {offsets = [0, 0], sizes = [8, 8], strides = [1, 1]} : vector<8x32xf32> to vector<8x8xf32>
    %21 = arith.truncf %18 : vector<8x8xf32> to vector<8x8xbf16>
    %22 = arith.truncf %19 : vector<8x8xf32> to vector<8x8xbf16>
    %cst_14 = arith.constant dense<0.000000e+00> : vector<8x8xf32>
    %23 = tpu.matmul %21, %22, %cst_14 {dimension_numbers = #tpu.dot_dimension_numbers<[1], [1], [0], [0], [0, 0, 1, 0], [], []>} : vector<8x8xbf16>, vector<8x8xbf16>, vector<8x8xf32> -> vector<8x8xf32>
    %cst_15 = arith.constant 0.353553385 : f32
    %24 = vector.broadcast %cst_15 : f32 to vector<8x8xf32>
    %25 = arith.mulf %23, %24 : vector<8x8xf32>
    %cst_16 = arith.constant dense<0xFF800000> : vector<8xf32>
    %26 = vector.multi_reduction <maximumf>, %25, %cst_16 [1] : vector<8x8xf32> to vector<8xf32>
    %27 = vector.shape_cast %26 : vector<8xf32> to vector<8x1xf32>
    %28 = vector.broadcast %27 : vector<8x1xf32> to vector<8x8xf32>
    %29 = arith.subf %25, %28 : vector<8x8xf32>
    %30 = math.exp %29 : vector<8x8xf32>
    %cst_17 = arith.constant dense<0.000000e+00> : vector<8xf32>
    %31 = vector.multi_reduction <add>, %30, %cst_17 [1] : vector<8x8xf32> to vector<8xf32>
    %32 = vector.shape_cast %31 : vector<8xf32> to vector<8x1xf32>
    %33 = tpu.reciprocal %32 {approx = true} : vector<8x1xf32> -> vector<8x1xf32>
    %34 = vector.broadcast %33 : vector<8x1xf32> to vector<8x8xf32>
    %35 = arith.mulf %30, %34 : vector<8x8xf32>
    %36 = arith.truncf %35 : vector<8x8xf32> to vector<8x8xbf16>
    %37 = arith.truncf %20 : vector<8x8xf32> to vector<8x8xbf16>
    %cst_18 = arith.constant dense<0.000000e+00> : vector<8x8xf32>
    %38 = tpu.matmul %36, %37, %cst_18 {dimension_numbers = #tpu.dot_dimension_numbers<[1], [0], [0], [1], [0, 0, 1, 1], [], []>} : vector<8x8xbf16>, vector<8x8xbf16>, vector<8x8xf32> -> vector<8x8xf32>
    %39 = vector.extract_strided_slice %9 {offsets = [0, 8], sizes = [8, 8], strides = [1, 1]} : vector<8x32xf32> to vector<8x8xf32>
    %40 = vector.extract_strided_slice %16 {offsets = [0, 8], sizes = [8, 8], strides = [1, 1]} : vector<8x32xf32> to vector<8x8xf32>
    %41 = vector.extract_strided_slice %17 {offsets = [0, 8], sizes = [8, 8], strides = [1, 1]} : vector<8x32xf32> to vector<8x8xf32>
    %42 = arith.truncf %39 : vector<8x8xf32> to vector<8x8xbf16>
    %43 = arith.truncf %40 : vector<8x8xf32> to vector<8x8xbf16>
    %cst_19 = arith.constant dense<0.000000e+00> : vector<8x8xf32>
    %44 = tpu.matmul %42, %43, %cst_19 {dimension_numbers = #tpu.dot_dimension_numbers<[1], [1], [0], [0], [0, 0, 1, 0], [], []>} : vector<8x8xbf16>, vector<8x8xbf16>, vector<8x8xf32> -> vector<8x8xf32>
    %cst_20 = arith.constant 0.353553385 : f32
    %45 = vector.broadcast %cst_20 : f32 to vector<8x8xf32>
    %46 = arith.mulf %44, %45 : vector<8x8xf32>
    %cst_21 = arith.constant dense<0xFF800000> : vector<8xf32>
    %47 = vector.multi_reduction <maximumf>, %46, %cst_21 [1] : vector<8x8xf32> to vector<8xf32>
    %48 = vector.shape_cast %47 : vector<8xf32> to vector<8x1xf32>
    %49 = vector.broadcast %48 : vector<8x1xf32> to vector<8x8xf32>
    %50 = arith.subf %46, %49 : vector<8x8xf32>
    %51 = math.exp %50 : vector<8x8xf32>
    %cst_22 = arith.constant dense<0.000000e+00> : vector<8xf32>
    %52 = vector.multi_reduction <add>, %51, %cst_22 [1] : vector<8x8xf32> to vector<8xf32>
    %53 = vector.shape_cast %52 : vector<8xf32> to vector<8x1xf32>
    %54 = tpu.reciprocal %53 {approx = true} : vector<8x1xf32> -> vector<8x1xf32>
    %55 = vector.broadcast %54 : vector<8x1xf32> to vector<8x8xf32>
    %56 = arith.mulf %51, %55 : vector<8x8xf32>
    %57 = arith.truncf %56 : vector<8x8xf32> to vector<8x8xbf16>
    %58 = arith.truncf %41 : vector<8x8xf32> to vector<8x8xbf16>
    %cst_23 = arith.constant dense<0.000000e+00> : vector<8x8xf32>
    %59 = tpu.matmul %57, %58, %cst_23 {dimension_numbers = #tpu.dot_dimension_numbers<[1], [0], [0], [1], [0, 0, 1, 1], [], []>} : vector<8x8xbf16>, vector<8x8xbf16>, vector<8x8xf32> -> vector<8x8xf32>
    %60 = vector.extract_strided_slice %9 {offsets = [0, 16], sizes = [8, 8], strides = [1, 1]} : vector<8x32xf32> to vector<8x8xf32>
    %61 = vector.extract_strided_slice %16 {offsets = [0, 16], sizes = [8, 8], strides = [1, 1]} : vector<8x32xf32> to vector<8x8xf32>
    %62 = vector.extract_strided_slice %17 {offsets = [0, 16], sizes = [8, 8], strides = [1, 1]} : vector<8x32xf32> to vector<8x8xf32>
    %63 = arith.truncf %60 : vector<8x8xf32> to vector<8x8xbf16>
    %64 = arith.truncf %61 : vector<8x8xf32> to vector<8x8xbf16>
    %cst_24 = arith.constant dense<0.000000e+00> : vector<8x8xf32>
    %65 = tpu.matmul %63, %64, %cst_24 {dimension_numbers = #tpu.dot_dimension_numbers<[1], [1], [0], [0], [0, 0, 1, 0], [], []>} : vector<8x8xbf16>, vector<8x8xbf16>, vector<8x8xf32> -> vector<8x8xf32>
    %cst_25 = arith.constant 0.353553385 : f32
    %66 = vector.broadcast %cst_25 : f32 to vector<8x8xf32>
    %67 = arith.mulf %65, %66 : vector<8x8xf32>
    %cst_26 = arith.constant dense<0xFF800000> : vector<8xf32>
    %68 = vector.multi_reduction <maximumf>, %67, %cst_26 [1] : vector<8x8xf32> to vector<8xf32>
    %69 = vector.shape_cast %68 : vector<8xf32> to vector<8x1xf32>
    %70 = vector.broadcast %69 : vector<8x1xf32> to vector<8x8xf32>
    %71 = arith.subf %67, %70 : vector<8x8xf32>
    %72 = math.exp %71 : vector<8x8xf32>
    %cst_27 = arith.constant dense<0.000000e+00> : vector<8xf32>
    %73 = vector.multi_reduction <add>, %72, %cst_27 [1] : vector<8x8xf32> to vector<8xf32>
    %74 = vector.shape_cast %73 : vector<8xf32> to vector<8x1xf32>
    %75 = tpu.reciprocal %74 {approx = true} : vector<8x1xf32> -> vector<8x1xf32>
    %76 = vector.broadcast %75 : vector<8x1xf32> to vector<8x8xf32>
    %77 = arith.mulf %72, %76 : vector<8x8xf32>
    %78 = arith.truncf %77 : vector<8x8xf32> to vector<8x8xbf16>
    %79 = arith.truncf %62 : vector<8x8xf32> to vector<8x8xbf16>
    %cst_28 = arith.constant dense<0.000000e+00> : vector<8x8xf32>
    %80 = tpu.matmul %78, %79, %cst_28 {dimension_numbers = #tpu.dot_dimension_numbers<[1], [0], [0], [1], [0, 0, 1, 1], [], []>} : vector<8x8xbf16>, vector<8x8xbf16>, vector<8x8xf32> -> vector<8x8xf32>
    %81 = vector.extract_strided_slice %9 {offsets = [0, 24], sizes = [8, 8], strides = [1, 1]} : vector<8x32xf32> to vector<8x8xf32>
    %82 = vector.extract_strided_slice %16 {offsets = [0, 24], sizes = [8, 8], strides = [1, 1]} : vector<8x32xf32> to vector<8x8xf32>
    %83 = vector.extract_strided_slice %17 {offsets = [0, 24], sizes = [8, 8], strides = [1, 1]} : vector<8x32xf32> to vector<8x8xf32>
    %84 = arith.truncf %81 : vector<8x8xf32> to vector<8x8xbf16>
    %85 = arith.truncf %82 : vector<8x8xf32> to vector<8x8xbf16>
    %cst_29 = arith.constant dense<0.000000e+00> : vector<8x8xf32>
    %86 = tpu.matmul %84, %85, %cst_29 {dimension_numbers = #tpu.dot_dimension_numbers<[1], [1], [0], [0], [0, 0, 1, 0], [], []>} : vector<8x8xbf16>, vector<8x8xbf16>, vector<8x8xf32> -> vector<8x8xf32>
    %cst_30 = arith.constant 0.353553385 : f32
    %87 = vector.broadcast %cst_30 : f32 to vector<8x8xf32>
    %88 = arith.mulf %86, %87 : vector<8x8xf32>
    %cst_31 = arith.constant dense<0xFF800000> : vector<8xf32>
    %89 = vector.multi_reduction <maximumf>, %88, %cst_31 [1] : vector<8x8xf32> to vector<8xf32>
    %90 = vector.shape_cast %89 : vector<8xf32> to vector<8x1xf32>
    %91 = vector.broadcast %90 : vector<8x1xf32> to vector<8x8xf32>
    %92 = arith.subf %88, %91 : vector<8x8xf32>
    %93 = math.exp %92 : vector<8x8xf32>
    %cst_32 = arith.constant dense<0.000000e+00> : vector<8xf32>
    %94 = vector.multi_reduction <add>, %93, %cst_32 [1] : vector<8x8xf32> to vector<8xf32>
    %95 = vector.shape_cast %94 : vector<8xf32> to vector<8x1xf32>
    %96 = tpu.reciprocal %95 {approx = true} : vector<8x1xf32> -> vector<8x1xf32>
    %97 = vector.broadcast %96 : vector<8x1xf32> to vector<8x8xf32>
    %98 = arith.mulf %93, %97 : vector<8x8xf32>
    %99 = arith.truncf %98 : vector<8x8xf32> to vector<8x8xbf16>
    %100 = arith.truncf %83 : vector<8x8xf32> to vector<8x8xbf16>
    %cst_33 = arith.constant dense<0.000000e+00> : vector<8x8xf32>
    %101 = tpu.matmul %99, %100, %cst_33 {dimension_numbers = #tpu.dot_dimension_numbers<[1], [0], [0], [1], [0, 0, 1, 1], [], []>} : vector<8x8xbf16>, vector<8x8xbf16>, vector<8x8xf32> -> vector<8x8xf32>
    %102 = tpu.concatenate %38, %59, %80, %101 in 1 : vector<8x8xf32>, vector<8x8xf32>, vector<8x8xf32>, vector<8x8xf32> -> vector<8x32xf32>
    %103 = arith.truncf %102 : vector<8x32xf32> to vector<8x32xbf16>
    %c0_34 = arith.constant 0 : index
    %c0_35 = arith.constant 0 : index
    %104 = vector.load %arg7[%c0_34, %c0_35] : memref<32x32xbf16, #tpu.memory_space<vmem>>, vector<32x32xbf16>
    %cst_36 = arith.constant dense<0.000000e+00> : vector<8x32xf32>
    %105 = tpu.matmul %103, %104, %cst_36 {dimension_numbers = #tpu.dot_dimension_numbers<[1], [0], [0], [1], [0, 0, 1, 1], [], []>} : vector<8x32xbf16>, vector<32x32xbf16>, vector<8x32xf32> -> vector<8x32xf32>
    %c0_37 = arith.constant 0 : index
    %c0_38 = arith.constant 0 : index
    %106 = vector.load %arg8[%c0_37, %c0_38] : memref<1x32xf32, #tpu.memory_space<vmem>>, vector<1x32xf32>
    %107 = vector.broadcast %106 : vector<1x32xf32> to vector<8x32xf32>
    %108 = arith.addf %105, %107 : vector<8x32xf32>
    %109 = arith.addf %108, %1 : vector<8x32xf32>
    %cst_39 = arith.constant dense<0.000000e+00> : vector<8xf32>
    %110 = vector.multi_reduction <add>, %109, %cst_39 [1] : vector<8x32xf32> to vector<8xf32>
    %111 = vector.shape_cast %110 : vector<8xf32> to vector<8x1xf32>
    %cst_40 = arith.constant 3.200000e+01 : f32
    %112 = vector.broadcast %cst_40 : f32 to vector<8x1xf32>
    %113 = arith.divf %111, %112 : vector<8x1xf32>
    %114 = vector.broadcast %113 : vector<8x1xf32> to vector<8x32xf32>
    %115 = arith.subf %109, %114 : vector<8x32xf32>
    %116 = arith.mulf %115, %115 : vector<8x32xf32>
    %cst_41 = arith.constant dense<0.000000e+00> : vector<8xf32>
    %117 = vector.multi_reduction <add>, %116, %cst_41 [1] : vector<8x32xf32> to vector<8xf32>
    %118 = vector.shape_cast %117 : vector<8xf32> to vector<8x1xf32>
    %cst_42 = arith.constant 3.200000e+01 : f32
    %119 = vector.broadcast %cst_42 : f32 to vector<8x1xf32>
    %120 = arith.divf %118, %119 : vector<8x1xf32>
    %121 = vector.broadcast %113 : vector<8x1xf32> to vector<8x32xf32>
    %122 = arith.subf %109, %121 : vector<8x32xf32>
    %cst_43 = arith.constant 9.99999974E-6 : f32
    %123 = vector.broadcast %cst_43 : f32 to vector<8x1xf32>
    %124 = arith.addf %120, %123 : vector<8x1xf32>
    %125 = math.rsqrt %124 : vector<8x1xf32>
    %126 = vector.broadcast %125 : vector<8x1xf32> to vector<8x32xf32>
    %127 = arith.mulf %122, %126 : vector<8x32xf32>
    %c0_44 = arith.constant 0 : index
    %c0_45 = arith.constant 0 : index
    %128 = vector.load %arg9[%c0_44, %c0_45] : memref<1x32xf32, #tpu.memory_space<vmem>>, vector<1x32xf32>
    %129 = vector.broadcast %128 : vector<1x32xf32> to vector<8x32xf32>
    %130 = arith.mulf %127, %129 : vector<8x32xf32>
    %c0_46 = arith.constant 0 : index
    %c0_47 = arith.constant 0 : index
    %131 = vector.load %arg10[%c0_46, %c0_47] : memref<1x32xf32, #tpu.memory_space<vmem>>, vector<1x32xf32>
    %132 = vector.broadcast %131 : vector<1x32xf32> to vector<8x32xf32>
    %133 = arith.addf %130, %132 : vector<8x32xf32>
    %c0_48 = arith.constant 0 : index
    %c0_49 = arith.constant 0 : index
    %c0_50 = arith.constant 0 : index
    %134 = vector.load %arg11[%c0_48, %c0_49, %c0_50] : memref<1x8x32xf32, #tpu.memory_space<vmem>>, vector<1x8x32xf32>
    %135 = vector.shape_cast %134 : vector<1x8x32xf32> to vector<8x32xf32>
    %136 = vector.shape_cast %133 : vector<8x32xf32> to vector<1x8x32xf32>
    tpu.vector_store %arg11[%c0_48, %c0_49, %c0_50], %136 {strides = array<i32>} : memref<1x8x32xf32, #tpu.memory_space<vmem>>, vector<1x8x32xf32>,
    return
  }
  func.func @transform_0(%arg0: i32) -> (i32, i32, i32) {
    %c0_i32 = arith.constant 0 : i32
    %c0_i32_0 = arith.constant 0 : i32
    %c0_i32_1 = arith.constant 0 : i32
    return %arg0, %c0_i32, %c0_i32_0 : i32, i32, i32
  }
  func.func @transform_1(%arg0: i32) -> (i32, i32, i32) {
    %c0_i32 = arith.constant 0 : i32
    %c0_i32_0 = arith.constant 0 : i32
    %c0_i32_1 = arith.constant 0 : i32
    return %arg0, %c0_i32, %c0_i32_0 : i32, i32, i32
  }
  func.func @transform_2(%arg0: i32) -> (i32, i32) {
    %c0_i32 = arith.constant 0 : i32
    %c0_i32_0 = arith.constant 0 : i32
    %c0_i32_1 = arith.constant 0 : i32
    return %c0_i32, %c0_i32_0 : i32, i32
  }
  func.func @transform_3(%arg0: i32) -> (i32, i32) {
    %c0_i32 = arith.constant 0 : i32
    %c0_i32_0 = arith.constant 0 : i32
    %c0_i32_1 = arith.constant 0 : i32
    return %c0_i32, %c0_i32_0 : i32, i32
  }
  func.func @transform_4(%arg0: i32) -> (i32, i32) {
    %c0_i32 = arith.constant 0 : i32
    %c0_i32_0 = arith.constant 0 : i32
    %c0_i32_1 = arith.constant 0 : i32
    return %c0_i32, %c0_i32_0 : i32, i32
  }
  func.func @transform_5(%arg0: i32) -> (i32, i32) {
    %c0_i32 = arith.constant 0 : i32
    %c0_i32_0 = arith.constant 0 : i32
    %c0_i32_1 = arith.constant 0 : i32
    return %c0_i32, %c0_i32_0 : i32, i32
  }
  func.func @transform_6(%arg0: i32) -> (i32, i32) {
    %c0_i32 = arith.constant 0 : i32
    %c0_i32_0 = arith.constant 0 : i32
    %c0_i32_1 = arith.constant 0 : i32
    return %c0_i32, %c0_i32_0 : i32, i32
  }
  func.func @transform_7(%arg0: i32) -> (i32, i32) {
    %c0_i32 = arith.constant 0 : i32
    %c0_i32_0 = arith.constant 0 : i32
    %c0_i32_1 = arith.constant 0 : i32
    return %c0_i32, %c0_i32_0 : i32, i32
  }
  func.func @transform_8(%arg0: i32) -> (i32, i32) {
    %c0_i32 = arith.constant 0 : i32
    %c0_i32_0 = arith.constant 0 : i32
    %c0_i32_1 = arith.constant 0 : i32
    return %c0_i32, %c0_i32_0 : i32, i32
  }
  func.func @transform_9(%arg0: i32) -> (i32, i32) {
    %c0_i32 = arith.constant 0 : i32
    %c0_i32_0 = arith.constant 0 : i32
    %c0_i32_1 = arith.constant 0 : i32
    return %c0_i32, %c0_i32_0 : i32, i32
  }
  func.func @transform_10(%arg0: i32) -> (i32, i32, i32) {
    %c0_i32 = arith.constant 0 : i32
    %c0_i32_0 = arith.constant 0 : i32
    %c0_i32_1 = arith.constant 0 : i32
    return %arg0, %c0_i32, %c0_i32_0 : i32, i32, i32
  }
}

module attributes {stable_mosaic.version = 11 : i64} {
  func.func @_out_proj_kernel(%arg0: i32, %arg1: i32, %arg2: memref<8x32xf32, #tpu.memory_space<vmem>>, %arg3: memref<32x128xbf16, #tpu.memory_space<vmem>>, %arg4: memref<1x128xf32, #tpu.memory_space<vmem>>, %arg5: memref<8x128xf32, #tpu.memory_space<vmem>>) attributes {dimension_semantics = [#tpu.dimension_semantics<parallel>, #tpu.dimension_semantics<parallel>], iteration_bounds = array<i64: 2, 1>, scalar_prefetch = 0 : i64, scratch_operands = 0 : i64, tpu.core_type = #tpu.core_type<tc>, window_params = [{transform_indices = @transform_0, window_bounds = array<i64: 8, 32>}, {transform_indices = @transform_1, window_bounds = array<i64: 32, 128>}, {transform_indices = @transform_2, window_bounds = array<i64: 1, 128>}, {transform_indices = @transform_3, window_bounds = array<i64: 8, 128>}]} {
    %c0 = arith.constant 0 : index
    %c0_0 = arith.constant 0 : index
    %0 = vector.load %arg2[%c0, %c0_0] : memref<8x32xf32, #tpu.memory_space<vmem>>, vector<8x32xf32>
    %1 = arith.truncf %0 : vector<8x32xf32> to vector<8x32xbf16>
    %c0_1 = arith.constant 0 : index
    %c0_2 = arith.constant 0 : index
    %2 = vector.load %arg3[%c0_1, %c0_2] : memref<32x128xbf16, #tpu.memory_space<vmem>>, vector<32x128xbf16>
    %cst = arith.constant dense<0.000000e+00> : vector<8x128xf32>
    %3 = tpu.matmul %1, %2, %cst {dimension_numbers = #tpu.dot_dimension_numbers<[1], [0], [0], [1], [0, 0, 1, 1], [], []>} : vector<8x32xbf16>, vector<32x128xbf16>, vector<8x128xf32> -> vector<8x128xf32>
    %c0_3 = arith.constant 0 : index
    %c0_4 = arith.constant 0 : index
    %4 = vector.load %arg4[%c0_3, %c0_4] : memref<1x128xf32, #tpu.memory_space<vmem>>, vector<1x128xf32>
    %5 = vector.broadcast %4 : vector<1x128xf32> to vector<8x128xf32>
    %6 = arith.addf %3, %5 : vector<8x128xf32>
    %c0_5 = arith.constant 0 : index
    %c0_6 = arith.constant 0 : index
    %7 = vector.load %arg5[%c0_5, %c0_6] : memref<8x128xf32, #tpu.memory_space<vmem>>, vector<8x128xf32>
    tpu.vector_store %arg5[%c0_5, %c0_6], %6 {strides = array<i32>} : memref<8x128xf32, #tpu.memory_space<vmem>>, vector<8x128xf32>,
    return
  }
  func.func @transform_0(%arg0: i32, %arg1: i32) -> (i32, i32) {
    %c0_i32 = arith.constant 0 : i32
    %c0_i32_0 = arith.constant 0 : i32
    return %arg0, %c0_i32 : i32, i32
  }
  func.func @transform_1(%arg0: i32, %arg1: i32) -> (i32, i32) {
    %c0_i32 = arith.constant 0 : i32
    %c0_i32_0 = arith.constant 0 : i32
    return %c0_i32, %arg1 : i32, i32
  }
  func.func @transform_2(%arg0: i32, %arg1: i32) -> (i32, i32) {
    %c0_i32 = arith.constant 0 : i32
    %c0_i32_0 = arith.constant 0 : i32
    return %c0_i32, %arg1 : i32, i32
  }
  func.func @transform_3(%arg0: i32, %arg1: i32) -> (i32, i32) {
    %c0_i32 = arith.constant 0 : i32
    return %arg0, %arg1 : i32, i32
  }
}

module attributes {stable_mosaic.version = 11 : i64} {
  func.func @_mha_sublayer_kernel(%arg0: i32, %arg1: memref<1x8x32xf32, #tpu.memory_space<vmem>>, %arg2: memref<1x8x32xf32, #tpu.memory_space<vmem>>, %arg3: memref<32x32xbf16, #tpu.memory_space<vmem>>, %arg4: memref<1x32xf32, #tpu.memory_space<vmem>>, %arg5: memref<32x64xbf16, #tpu.memory_space<vmem>>, %arg6: memref<1x64xf32, #tpu.memory_space<vmem>>, %arg7: memref<32x32xbf16, #tpu.memory_space<vmem>>, %arg8: memref<1x32xf32, #tpu.memory_space<vmem>>, %arg9: memref<1x32xf32, #tpu.memory_space<vmem>>, %arg10: memref<1x32xf32, #tpu.memory_space<vmem>>, %arg11: memref<1x8x32xf32, #tpu.memory_space<vmem>>) attributes {dimension_semantics = [#tpu.dimension_semantics<parallel>], iteration_bounds = array<i64: 2>, scalar_prefetch = 0 : i64, scratch_operands = 0 : i64, tpu.core_type = #tpu.core_type<tc>, window_params = [{transform_indices = @transform_0, window_bounds = array<i64: 1, 8, 32>}, {transform_indices = @transform_1, window_bounds = array<i64: 1, 8, 32>}, {pipeline_mode = #tpu.pipeline_mode<synchronous>, transform_indices = @transform_2, window_bounds = array<i64: 32, 32>}, {pipeline_mode = #tpu.pipeline_mode<synchronous>, transform_indices = @transform_3, window_bounds = array<i64: 1, 32>}, {pipeline_mode = #tpu.pipeline_mode<synchronous>, transform_indices = @transform_4, window_bounds = array<i64: 32, 64>}, {pipeline_mode = #tpu.pipeline_mode<synchronous>, transform_indices = @transform_5, window_bounds = array<i64: 1, 64>}, {pipeline_mode = #tpu.pipeline_mode<synchronous>, transform_indices = @transform_6, window_bounds = array<i64: 32, 32>}, {pipeline_mode = #tpu.pipeline_mode<synchronous>, transform_indices = @transform_7, window_bounds = array<i64: 1, 32>}, {pipeline_mode = #tpu.pipeline_mode<synchronous>, transform_indices = @transform_8, window_bounds = array<i64: 1, 32>}, {pipeline_mode = #tpu.pipeline_mode<synchronous>, transform_indices = @transform_9, window_bounds = array<i64: 1, 32>}, {transform_indices = @transform_10, window_bounds = array<i64: 1, 8, 32>}]} {
    %c0 = arith.constant 0 : index
    %c0_0 = arith.constant 0 : index
    %c0_1 = arith.constant 0 : index
    %0 = vector.load %arg1[%c0, %c0_0, %c0_1] : memref<1x8x32xf32, #tpu.memory_space<vmem>>, vector<1x8x32xf32>
    %1 = vector.shape_cast %0 : vector<1x8x32xf32> to vector<8x32xf32>
    %c0_2 = arith.constant 0 : index
    %c0_3 = arith.constant 0 : index
    %c0_4 = arith.constant 0 : index
    %2 = vector.load %arg2[%c0_2, %c0_3, %c0_4] : memref<1x8x32xf32, #tpu.memory_space<vmem>>, vector<1x8x32xf32>
    %3 = vector.shape_cast %2 : vector<1x8x32xf32> to vector<8x32xf32>
    %4 = arith.truncf %1 : vector<8x32xf32> to vector<8x32xbf16>
    %c0_5 = arith.constant 0 : index
    %c0_6 = arith.constant 0 : index
    %5 = vector.load %arg3[%c0_5, %c0_6] : memref<32x32xbf16, #tpu.memory_space<vmem>>, vector<32x32xbf16>
    %cst = arith.constant dense<0.000000e+00> : vector<8x32xf32>
    %6 = tpu.matmul %4, %5, %cst {dimension_numbers = #tpu.dot_dimension_numbers<[1], [0], [0], [1], [0, 0, 1, 1], [], []>} : vector<8x32xbf16>, vector<32x32xbf16>, vector<8x32xf32> -> vector<8x32xf32>
    %c0_7 = arith.constant 0 : index
    %c0_8 = arith.constant 0 : index
    %7 = vector.load %arg4[%c0_7, %c0_8] : memref<1x32xf32, #tpu.memory_space<vmem>>, vector<1x32xf32>
    %8 = vector.broadcast %7 : vector<1x32xf32> to vector<8x32xf32>
    %9 = arith.addf %6, %8 : vector<8x32xf32>
    %10 = arith.truncf %3 : vector<8x32xf32> to vector<8x32xbf16>
    %c0_9 = arith.constant 0 : index
    %c0_10 = arith.constant 0 : index
    %11 = vector.load %arg5[%c0_9, %c0_10] : memref<32x64xbf16, #tpu.memory_space<vmem>>, vector<32x64xbf16>
    %cst_11 = arith.constant dense<0.000000e+00> : vector<8x64xf32>
    %12 = tpu.matmul %10, %11, %cst_11 {dimension_numbers = #tpu.dot_dimension_numbers<[1], [0], [0], [1], [0, 0, 1, 1], [], []>} : vector<8x32xbf16>, vector<32x64xbf16>, vector<8x64xf32> -> vector<8x64xf32>
    %c0_12 = arith.constant 0 : index
    %c0_13 = arith.constant 0 : index
    %13 = vector.load %arg6[%c0_12, %c0_13] : memref<1x64xf32, #tpu.memory_space<vmem>>, vector<1x64xf32>
    %14 = vector.broadcast %13 : vector<1x64xf32> to vector<8x64xf32>
    %15 = arith.addf %12, %14 : vector<8x64xf32>
    %16 = vector.extract_strided_slice %15 {offsets = [0, 0], sizes = [8, 32], strides = [1, 1]} : vector<8x64xf32> to vector<8x32xf32>
    %17 = vector.extract_strided_slice %15 {offsets = [0, 32], sizes = [8, 32], strides = [1, 1]} : vector<8x64xf32> to vector<8x32xf32>
    %18 = tpu.iota {dimensions = array<i32: 0>} : vector<8x8xi32>
    %19 = tpu.iota {dimensions = array<i32: 1>} : vector<8x8xi32>
    %20 = arith.cmpi sgt, %19, %18 : vector<8x8xi32>
    %cst_14 = arith.constant -1.000000e+09 : f32
    %cst_15 = arith.constant 0.000000e+00 : f32
    %21 = vector.broadcast %cst_14 : f32 to vector<8x8xf32>
    %22 = vector.broadcast %cst_15 : f32 to vector<8x8xf32>
    %23 = arith.select %20, %21, %22 : vector<8x8xi1>, vector<8x8xf32>
    %24 = vector.extract_strided_slice %9 {offsets = [0, 0], sizes = [8, 8], strides = [1, 1]} : vector<8x32xf32> to vector<8x8xf32>
    %25 = vector.extract_strided_slice %16 {offsets = [0, 0], sizes = [8, 8], strides = [1, 1]} : vector<8x32xf32> to vector<8x8xf32>
    %26 = vector.extract_strided_slice %17 {offsets = [0, 0], sizes = [8, 8], strides = [1, 1]} : vector<8x32xf32> to vector<8x8xf32>
    %27 = arith.truncf %24 : vector<8x8xf32> to vector<8x8xbf16>
    %28 = arith.truncf %25 : vector<8x8xf32> to vector<8x8xbf16>
    %cst_16 = arith.constant dense<0.000000e+00> : vector<8x8xf32>
    %29 = tpu.matmul %27, %28, %cst_16 {dimension_numbers = #tpu.dot_dimension_numbers<[1], [1], [0], [0], [0, 0, 1, 0], [], []>} : vector<8x8xbf16>, vector<8x8xbf16>, vector<8x8xf32> -> vector<8x8xf32>
    %cst_17 = arith.constant 0.353553385 : f32
    %30 = vector.broadcast %cst_17 : f32 to vector<8x8xf32>
    %31 = arith.mulf %29, %30 : vector<8x8xf32>
    %32 = arith.addf %31, %23 : vector<8x8xf32>
    %cst_18 = arith.constant dense<0xFF800000> : vector<8xf32>
    %33 = vector.multi_reduction <maximumf>, %32, %cst_18 [1] : vector<8x8xf32> to vector<8xf32>
    %34 = vector.shape_cast %33 : vector<8xf32> to vector<8x1xf32>
    %35 = vector.broadcast %34 : vector<8x1xf32> to vector<8x8xf32>
    %36 = arith.subf %32, %35 : vector<8x8xf32>
    %37 = math.exp %36 : vector<8x8xf32>
    %cst_19 = arith.constant dense<0.000000e+00> : vector<8xf32>
    %38 = vector.multi_reduction <add>, %37, %cst_19 [1] : vector<8x8xf32> to vector<8xf32>
    %39 = vector.shape_cast %38 : vector<8xf32> to vector<8x1xf32>
    %40 = tpu.reciprocal %39 {approx = true} : vector<8x1xf32> -> vector<8x1xf32>
    %41 = vector.broadcast %40 : vector<8x1xf32> to vector<8x8xf32>
    %42 = arith.mulf %37, %41 : vector<8x8xf32>
    %43 = arith.truncf %42 : vector<8x8xf32> to vector<8x8xbf16>
    %44 = arith.truncf %26 : vector<8x8xf32> to vector<8x8xbf16>
    %cst_20 = arith.constant dense<0.000000e+00> : vector<8x8xf32>
    %45 = tpu.matmul %43, %44, %cst_20 {dimension_numbers = #tpu.dot_dimension_numbers<[1], [0], [0], [1], [0, 0, 1, 1], [], []>} : vector<8x8xbf16>, vector<8x8xbf16>, vector<8x8xf32> -> vector<8x8xf32>
    %46 = vector.extract_strided_slice %9 {offsets = [0, 8], sizes = [8, 8], strides = [1, 1]} : vector<8x32xf32> to vector<8x8xf32>
    %47 = vector.extract_strided_slice %16 {offsets = [0, 8], sizes = [8, 8], strides = [1, 1]} : vector<8x32xf32> to vector<8x8xf32>
    %48 = vector.extract_strided_slice %17 {offsets = [0, 8], sizes = [8, 8], strides = [1, 1]} : vector<8x32xf32> to vector<8x8xf32>
    %49 = arith.truncf %46 : vector<8x8xf32> to vector<8x8xbf16>
    %50 = arith.truncf %47 : vector<8x8xf32> to vector<8x8xbf16>
    %cst_21 = arith.constant dense<0.000000e+00> : vector<8x8xf32>
    %51 = tpu.matmul %49, %50, %cst_21 {dimension_numbers = #tpu.dot_dimension_numbers<[1], [1], [0], [0], [0, 0, 1, 0], [], []>} : vector<8x8xbf16>, vector<8x8xbf16>, vector<8x8xf32> -> vector<8x8xf32>
    %cst_22 = arith.constant 0.353553385 : f32
    %52 = vector.broadcast %cst_22 : f32 to vector<8x8xf32>
    %53 = arith.mulf %51, %52 : vector<8x8xf32>
    %54 = arith.addf %53, %23 : vector<8x8xf32>
    %cst_23 = arith.constant dense<0xFF800000> : vector<8xf32>
    %55 = vector.multi_reduction <maximumf>, %54, %cst_23 [1] : vector<8x8xf32> to vector<8xf32>
    %56 = vector.shape_cast %55 : vector<8xf32> to vector<8x1xf32>
    %57 = vector.broadcast %56 : vector<8x1xf32> to vector<8x8xf32>
    %58 = arith.subf %54, %57 : vector<8x8xf32>
    %59 = math.exp %58 : vector<8x8xf32>
    %cst_24 = arith.constant dense<0.000000e+00> : vector<8xf32>
    %60 = vector.multi_reduction <add>, %59, %cst_24 [1] : vector<8x8xf32> to vector<8xf32>
    %61 = vector.shape_cast %60 : vector<8xf32> to vector<8x1xf32>
    %62 = tpu.reciprocal %61 {approx = true} : vector<8x1xf32> -> vector<8x1xf32>
    %63 = vector.broadcast %62 : vector<8x1xf32> to vector<8x8xf32>
    %64 = arith.mulf %59, %63 : vector<8x8xf32>
    %65 = arith.truncf %64 : vector<8x8xf32> to vector<8x8xbf16>
    %66 = arith.truncf %48 : vector<8x8xf32> to vector<8x8xbf16>
    %cst_25 = arith.constant dense<0.000000e+00> : vector<8x8xf32>
    %67 = tpu.matmul %65, %66, %cst_25 {dimension_numbers = #tpu.dot_dimension_numbers<[1], [0], [0], [1], [0, 0, 1, 1], [], []>} : vector<8x8xbf16>, vector<8x8xbf16>, vector<8x8xf32> -> vector<8x8xf32>
    %68 = vector.extract_strided_slice %9 {offsets = [0, 16], sizes = [8, 8], strides = [1, 1]} : vector<8x32xf32> to vector<8x8xf32>
    %69 = vector.extract_strided_slice %16 {offsets = [0, 16], sizes = [8, 8], strides = [1, 1]} : vector<8x32xf32> to vector<8x8xf32>
    %70 = vector.extract_strided_slice %17 {offsets = [0, 16], sizes = [8, 8], strides = [1, 1]} : vector<8x32xf32> to vector<8x8xf32>
    %71 = arith.truncf %68 : vector<8x8xf32> to vector<8x8xbf16>
    %72 = arith.truncf %69 : vector<8x8xf32> to vector<8x8xbf16>
    %cst_26 = arith.constant dense<0.000000e+00> : vector<8x8xf32>
    %73 = tpu.matmul %71, %72, %cst_26 {dimension_numbers = #tpu.dot_dimension_numbers<[1], [1], [0], [0], [0, 0, 1, 0], [], []>} : vector<8x8xbf16>, vector<8x8xbf16>, vector<8x8xf32> -> vector<8x8xf32>
    %cst_27 = arith.constant 0.353553385 : f32
    %74 = vector.broadcast %cst_27 : f32 to vector<8x8xf32>
    %75 = arith.mulf %73, %74 : vector<8x8xf32>
    %76 = arith.addf %75, %23 : vector<8x8xf32>
    %cst_28 = arith.constant dense<0xFF800000> : vector<8xf32>
    %77 = vector.multi_reduction <maximumf>, %76, %cst_28 [1] : vector<8x8xf32> to vector<8xf32>
    %78 = vector.shape_cast %77 : vector<8xf32> to vector<8x1xf32>
    %79 = vector.broadcast %78 : vector<8x1xf32> to vector<8x8xf32>
    %80 = arith.subf %76, %79 : vector<8x8xf32>
    %81 = math.exp %80 : vector<8x8xf32>
    %cst_29 = arith.constant dense<0.000000e+00> : vector<8xf32>
    %82 = vector.multi_reduction <add>, %81, %cst_29 [1] : vector<8x8xf32> to vector<8xf32>
    %83 = vector.shape_cast %82 : vector<8xf32> to vector<8x1xf32>
    %84 = tpu.reciprocal %83 {approx = true} : vector<8x1xf32> -> vector<8x1xf32>
    %85 = vector.broadcast %84 : vector<8x1xf32> to vector<8x8xf32>
    %86 = arith.mulf %81, %85 : vector<8x8xf32>
    %87 = arith.truncf %86 : vector<8x8xf32> to vector<8x8xbf16>
    %88 = arith.truncf %70 : vector<8x8xf32> to vector<8x8xbf16>
    %cst_30 = arith.constant dense<0.000000e+00> : vector<8x8xf32>
    %89 = tpu.matmul %87, %88, %cst_30 {dimension_numbers = #tpu.dot_dimension_numbers<[1], [0], [0], [1], [0, 0, 1, 1], [], []>} : vector<8x8xbf16>, vector<8x8xbf16>, vector<8x8xf32> -> vector<8x8xf32>
    %90 = vector.extract_strided_slice %9 {offsets = [0, 24], sizes = [8, 8], strides = [1, 1]} : vector<8x32xf32> to vector<8x8xf32>
    %91 = vector.extract_strided_slice %16 {offsets = [0, 24], sizes = [8, 8], strides = [1, 1]} : vector<8x32xf32> to vector<8x8xf32>
    %92 = vector.extract_strided_slice %17 {offsets = [0, 24], sizes = [8, 8], strides = [1, 1]} : vector<8x32xf32> to vector<8x8xf32>
    %93 = arith.truncf %90 : vector<8x8xf32> to vector<8x8xbf16>
    %94 = arith.truncf %91 : vector<8x8xf32> to vector<8x8xbf16>
    %cst_31 = arith.constant dense<0.000000e+00> : vector<8x8xf32>
    %95 = tpu.matmul %93, %94, %cst_31 {dimension_numbers = #tpu.dot_dimension_numbers<[1], [1], [0], [0], [0, 0, 1, 0], [], []>} : vector<8x8xbf16>, vector<8x8xbf16>, vector<8x8xf32> -> vector<8x8xf32>
    %cst_32 = arith.constant 0.353553385 : f32
    %96 = vector.broadcast %cst_32 : f32 to vector<8x8xf32>
    %97 = arith.mulf %95, %96 : vector<8x8xf32>
    %98 = arith.addf %97, %23 : vector<8x8xf32>
    %cst_33 = arith.constant dense<0xFF800000> : vector<8xf32>
    %99 = vector.multi_reduction <maximumf>, %98, %cst_33 [1] : vector<8x8xf32> to vector<8xf32>
    %100 = vector.shape_cast %99 : vector<8xf32> to vector<8x1xf32>
    %101 = vector.broadcast %100 : vector<8x1xf32> to vector<8x8xf32>
    %102 = arith.subf %98, %101 : vector<8x8xf32>
    %103 = math.exp %102 : vector<8x8xf32>
    %cst_34 = arith.constant dense<0.000000e+00> : vector<8xf32>
    %104 = vector.multi_reduction <add>, %103, %cst_34 [1] : vector<8x8xf32> to vector<8xf32>
    %105 = vector.shape_cast %104 : vector<8xf32> to vector<8x1xf32>
    %106 = tpu.reciprocal %105 {approx = true} : vector<8x1xf32> -> vector<8x1xf32>
    %107 = vector.broadcast %106 : vector<8x1xf32> to vector<8x8xf32>
    %108 = arith.mulf %103, %107 : vector<8x8xf32>
    %109 = arith.truncf %108 : vector<8x8xf32> to vector<8x8xbf16>
    %110 = arith.truncf %92 : vector<8x8xf32> to vector<8x8xbf16>
    %cst_35 = arith.constant dense<0.000000e+00> : vector<8x8xf32>
    %111 = tpu.matmul %109, %110, %cst_35 {dimension_numbers = #tpu.dot_dimension_numbers<[1], [0], [0], [1], [0, 0, 1, 1], [], []>} : vector<8x8xbf16>, vector<8x8xbf16>, vector<8x8xf32> -> vector<8x8xf32>
    %112 = tpu.concatenate %45, %67, %89, %111 in 1 : vector<8x8xf32>, vector<8x8xf32>, vector<8x8xf32>, vector<8x8xf32> -> vector<8x32xf32>
    %113 = arith.truncf %112 : vector<8x32xf32> to vector<8x32xbf16>
    %c0_36 = arith.constant 0 : index
    %c0_37 = arith.constant 0 : index
    %114 = vector.load %arg7[%c0_36, %c0_37] : memref<32x32xbf16, #tpu.memory_space<vmem>>, vector<32x32xbf16>
    %cst_38 = arith.constant dense<0.000000e+00> : vector<8x32xf32>
    %115 = tpu.matmul %113, %114, %cst_38 {dimension_numbers = #tpu.dot_dimension_numbers<[1], [0], [0], [1], [0, 0, 1, 1], [], []>} : vector<8x32xbf16>, vector<32x32xbf16>, vector<8x32xf32> -> vector<8x32xf32>
    %c0_39 = arith.constant 0 : index
    %c0_40 = arith.constant 0 : index
    %116 = vector.load %arg8[%c0_39, %c0_40] : memref<1x32xf32, #tpu.memory_space<vmem>>, vector<1x32xf32>
    %117 = vector.broadcast %116 : vector<1x32xf32> to vector<8x32xf32>
    %118 = arith.addf %115, %117 : vector<8x32xf32>
    %119 = arith.addf %118, %1 : vector<8x32xf32>
    %cst_41 = arith.constant dense<0.000000e+00> : vector<8xf32>
    %120 = vector.multi_reduction <add>, %119, %cst_41 [1] : vector<8x32xf32> to vector<8xf32>
    %121 = vector.shape_cast %120 : vector<8xf32> to vector<8x1xf32>
    %cst_42 = arith.constant 3.200000e+01 : f32
    %122 = vector.broadcast %cst_42 : f32 to vector<8x1xf32>
    %123 = arith.divf %121, %122 : vector<8x1xf32>
    %124 = vector.broadcast %123 : vector<8x1xf32> to vector<8x32xf32>
    %125 = arith.subf %119, %124 : vector<8x32xf32>
    %126 = arith.mulf %125, %125 : vector<8x32xf32>
    %cst_43 = arith.constant dense<0.000000e+00> : vector<8xf32>
    %127 = vector.multi_reduction <add>, %126, %cst_43 [1] : vector<8x32xf32> to vector<8xf32>
    %128 = vector.shape_cast %127 : vector<8xf32> to vector<8x1xf32>
    %cst_44 = arith.constant 3.200000e+01 : f32
    %129 = vector.broadcast %cst_44 : f32 to vector<8x1xf32>
    %130 = arith.divf %128, %129 : vector<8x1xf32>
    %131 = vector.broadcast %123 : vector<8x1xf32> to vector<8x32xf32>
    %132 = arith.subf %119, %131 : vector<8x32xf32>
    %cst_45 = arith.constant 9.99999974E-6 : f32
    %133 = vector.broadcast %cst_45 : f32 to vector<8x1xf32>
    %134 = arith.addf %130, %133 : vector<8x1xf32>
    %135 = math.rsqrt %134 : vector<8x1xf32>
    %136 = vector.broadcast %135 : vector<8x1xf32> to vector<8x32xf32>
    %137 = arith.mulf %132, %136 : vector<8x32xf32>
    %c0_46 = arith.constant 0 : index
    %c0_47 = arith.constant 0 : index
    %138 = vector.load %arg9[%c0_46, %c0_47] : memref<1x32xf32, #tpu.memory_space<vmem>>, vector<1x32xf32>
    %139 = vector.broadcast %138 : vector<1x32xf32> to vector<8x32xf32>
    %140 = arith.mulf %137, %139 : vector<8x32xf32>
    %c0_48 = arith.constant 0 : index
    %c0_49 = arith.constant 0 : index
    %141 = vector.load %arg10[%c0_48, %c0_49] : memref<1x32xf32, #tpu.memory_space<vmem>>, vector<1x32xf32>
    %142 = vector.broadcast %141 : vector<1x32xf32> to vector<8x32xf32>
    %143 = arith.addf %140, %142 : vector<8x32xf32>
    %c0_50 = arith.constant 0 : index
    %c0_51 = arith.constant 0 : index
    %c0_52 = arith.constant 0 : index
    %144 = vector.load %arg11[%c0_50, %c0_51, %c0_52] : memref<1x8x32xf32, #tpu.memory_space<vmem>>, vector<1x8x32xf32>
    %145 = vector.shape_cast %144 : vector<1x8x32xf32> to vector<8x32xf32>
    %146 = vector.shape_cast %143 : vector<8x32xf32> to vector<1x8x32xf32>
    tpu.vector_store %arg11[%c0_50, %c0_51, %c0_52], %146 {strides = array<i32>} : memref<1x8x32xf32, #tpu.memory_space<vmem>>, vector<1x8x32xf32>,
    return
  }
  func.func @transform_0(%arg0: i32) -> (i32, i32, i32) {
    %c0_i32 = arith.constant 0 : i32
    %c0_i32_0 = arith.constant 0 : i32
    %c0_i32_1 = arith.constant 0 : i32
    return %arg0, %c0_i32, %c0_i32_0 : i32, i32, i32
  }
  func.func @transform_1(%arg0: i32) -> (i32, i32, i32) {
    %c0_i32 = arith.constant 0 : i32
    %c0_i32_0 = arith.constant 0 : i32
    %c0_i32_1 = arith.constant 0 : i32
    return %arg0, %c0_i32, %c0_i32_0 : i32, i32, i32
  }
  func.func @transform_2(%arg0: i32) -> (i32, i32) {
    %c0_i32 = arith.constant 0 : i32
    %c0_i32_0 = arith.constant 0 : i32
    %c0_i32_1 = arith.constant 0 : i32
    return %c0_i32, %c0_i32_0 : i32, i32
  }
  func.func @transform_3(%arg0: i32) -> (i32, i32) {
    %c0_i32 = arith.constant 0 : i32
    %c0_i32_0 = arith.constant 0 : i32
    %c0_i32_1 = arith.constant 0 : i32
    return %c0_i32, %c0_i32_0 : i32, i32
  }
  func.func @transform_4(%arg0: i32) -> (i32, i32) {
    %c0_i32 = arith.constant 0 : i32
    %c0_i32_0 = arith.constant 0 : i32
    %c0_i32_1 = arith.constant 0 : i32
    return %c0_i32, %c0_i32_0 : i32, i32
  }
  func.func @transform_5(%arg0: i32) -> (i32, i32) {
    %c0_i32 = arith.constant 0 : i32
    %c0_i32_0 = arith.constant 0 : i32
    %c0_i32_1 = arith.constant 0 : i32
    return %c0_i32, %c0_i32_0 : i32, i32
  }
  func.func @transform_6(%arg0: i32) -> (i32, i32) {
    %c0_i32 = arith.constant 0 : i32
    %c0_i32_0 = arith.constant 0 : i32
    %c0_i32_1 = arith.constant 0 : i32
    return %c0_i32, %c0_i32_0 : i32, i32
  }
  func.func @transform_7(%arg0: i32) -> (i32, i32) {
    %c0_i32 = arith.constant 0 : i32
    %c0_i32_0 = arith.constant 0 : i32
    %c0_i32_1 = arith.constant 0 : i32
    return %c0_i32, %c0_i32_0 : i32, i32
  }
  func.func @transform_8(%arg0: i32) -> (i32, i32) {
    %c0_i32 = arith.constant 0 : i32
    %c0_i32_0 = arith.constant 0 : i32
    %c0_i32_1 = arith.constant 0 : i32
    return %c0_i32, %c0_i32_0 : i32, i32
  }
  func.func @transform_9(%arg0: i32) -> (i32, i32) {
    %c0_i32 = arith.constant 0 : i32
    %c0_i32_0 = arith.constant 0 : i32
    %c0_i32_1 = arith.constant 0 : i32
    return %c0_i32, %c0_i32_0 : i32, i32
  }
  func.func @transform_10(%arg0: i32) -> (i32, i32, i32) {
    %c0_i32 = arith.constant 0 : i32
    %c0_i32_0 = arith.constant 0 : i32
    %c0_i32_1 = arith.constant 0 : i32
    return %arg0, %c0_i32, %c0_i32_0 : i32, i32, i32
  }
}

</mosaic_0001>

<bundles_post_ra>
// kernel: transformer_forward.21
= control target key start
LH: loop header
LB: loop body
LE: loop exit
PB: predicated region body
PF: predicated region fallthrough
CT: control target
= control target key end

     0   :  { %s487_s12 = smov 0   ;;  %s489_s13 = smov 0   ;;  %s529_s0 = inlined_call_operand.vmem [shape: f32[16,32], index: 0, kind: input, shape index: {}]   ;;  %s530_s1 = inlined_call_operand.vmem [shape: bf16[32,128], index: 1, kind: input, shape index: {}]   ;;  %s531_s2 = inlined_call_operand.vmem [shape: f32[1,128], index: 2, kind: input, shape index: {}]   ;;  %s532_s3 = inlined_call_operand.vmem [shape: f32[16,128], index: 3, kind: output, shape index: {}]  }
   0x1   :  { %s491_s14 = smov 0  }
   0x2 LB: > { %s25_s15 = sadd.s32 1, %s459_s13  ;;  %p393_p0 = scmp.ge.s32.totalorder %s463_s14, 1  ;;  %s463_s14 = sphi %s491_s14, %s13_s14   ;;  %s459_s13 = sphi %s489_s13, %s534_s13   ;;  %s455_s12 = sphi %s487_s12, %s533_s12  }
   0x3   : > { %p27_p1 = scmp.ge.s32.totalorder %s25_s15, 2  ;;  %p167_p2 = scmp.lt.s32.totalorder %s463_s14, 3 }
   0x5   : > { %s536_s15 = smov (%p27_p1, %s25_s15), 0  ;;  %p168_p3 = pnand %p393_p0, %p167_p2 }
   0x6   : > { %p199_p4 = scmp.lt.s32.totalorder (!%p168_p3), %s455_s12, 1 }
   0x7   : > { %171 = sbr.rel (%p168_p3) target bundleno = 220 (0xdc), region = 32 }
   0xc   : > { %v439_v0 = vld [vmem:[%s530_s1 + $0x8] sm:$0xff]   ;;  %v465_v1 = vmov 0.0   ;;  %v440_v2 = vld [vmem:[%s530_s1] sm:$0xff]   ;;  %vm466_vm0 = vmmov 0   ;;  %s538_s12 = smov (!%p199_p4, %s455_s12), 1  ;;  %vm243_vm1 = vcmask 261120  }
   0xd   : > { %405 = vmatprep.subr.bf16.mxu0 %v465_v1  ;;  %409 = vmatprep.mubr.msk.bf16.mxu0 %vm466_vm0, %v465_v1  ;;  %s394_s20 = sshll.u32 %s538_s12, 3  ;;  %v396_v5 = vld [vmem:[%s531_s2] ss:$0 sm:$0xff] }
   0xe   : > { %406 = vmatpush3.bf16.msra.mxu0 %v439_v0  ;;  %s202_s23 = scalar_lea.vmem %s529_s0, %s394_s20  ;;  %s216_s28 = scalar_lea.vmem %s532_s3, %s394_s20 }
   0xf   : > { %407 = vmatprep.subr.bf16.mxu0 %v465_v1  ;;  %v218_v3 = vld [vmem:[%s202_s23] sm:$0xff] }
  0x10   : > { %v219_v4 = vpack.c.bf16 %v218_v3, %v218_v3 }
  0x12   : > { %408 = vmatpush3.bf16.msra.mxu0 %v440_v2 }
  0x15   : > { %410 = vmatmul.mubr.msk.bf16.vlgmr.msra.gmra.mxu0 %vm243_vm1, %v219_v4 }
  0xd5   : > { %v281_v6 = vpop.f32.mrf.mxu0 }
  0xd6   : > { %v282_v7 = vadd.f32 %v396_v5, %v281_v6 }
  0xd7   : > { %v411_v8 = vpop.f32.mrf.mxu0 }
  0xd8   : > { %287 = vst [vmem:[%s216_s28] sm:$0xff] %v282_v7 }
  0xd9   : > { %v284_v9 = vpop.f32.mrf.mxu0 }
  0xdb   : > { %v412_v10 = vpop.f32.mrf.mxu0 }
  0xdc PF: > { %s13_s14 = sadd.s32 1, %s463_s14   ;;  %s533_s12 = smov %s459_s13 }
  0xdd   : > { %p10_p5 = scmp.ge.s32.totalorder %s13_s14, 4   ;;  %s534_s13 = smov %s536_s15 }
  0xdf   :  { %12 = sbr.rel (!%p10_p5) target bundleno = 2 (0x2), region = 68 }

// kernel: transformer_forward.12
= control target key start
LH: loop header
LB: loop body
LE: loop exit
PB: predicated region body
PF: predicated region fallthrough
CT: control target
= control target key end

     0   :  { %s631_s24 = smov 0   ;;  %s689_s0 = inlined_call_operand.vmem [shape: f32[16,32], index: 0, kind: input, shape index: {}]   ;;  %s690_s1 = inlined_call_operand.vmem [shape: bf16[32,64], index: 1, kind: input, shape index: {}]   ;;  %s691_s2 = inlined_call_operand.vmem [shape: f32[1,64], index: 2, kind: input, shape index: {}]   ;;  %s692_s3 = inlined_call_operand.vmem [shape: bf16[64,32], index: 3, kind: input, shape index: {}]   ;;  %s693_s4 = inlined_call_operand.vmem [shape: f32[1,32], index: 4, kind: input, shape index: {}]   ;;  %s694_s5 = inlined_call_operand.vmem [shape: f32[1,32], index: 5, kind: input, shape index: {}]   ;;  %s695_s6 = inlined_call_operand.vmem [shape: f32[1,32], index: 6, kind: input, shape index: {}]   ;;  %s696_s7 = inlined_call_operand.vmem [shape: f32[16,32], index: 7, kind: output, shape index: {}]  }
   0x1 LB: > { %s514_s25 = sadd.s32 4294967295, %s587_s24   ;;  %p518_p0 = scmp.ge.s32.totalorder %s587_s24, 1  ;;  %s587_s24 = sphi %s631_s24, %s17_s24  }
   0x2   : > { %p236_p1 = scmp.lt.s32.totalorder %s587_s24, 3 }
   0x4   : > { %p237_p2 = pnand %p518_p0, %p236_p1 }
   0x5   : > { %p266_p3 = scmp.lt.s32.totalorder (!%p237_p2), %s514_s25, 1 }
   0x6   : > { %240 = sbr.rel (%p237_p2) target bundleno = 725 (0x2d5), region = 48 }
   0xb   : > { %v573_v0 = vld [vmem:[%s690_s1 + $0x8] sm:$0xff]   ;;  %v589_v1 = vmov 0.0   ;;  %v574_v2 = vld [vmem:[%s690_s1] sm:$0xff]   ;;  %vm590_vm0 = vmmov 0   ;;  %v575_v3 = vld [vmem:[%s692_s3 + $0x18] sm:$0xff]   ;;  %s698_s25 = smov (!%p266_p3, %s514_s25), 1 }
   0xc   : > { %543 = vmatprep.subr.bf16.mxu0 %v589_v1  ;;  %551 = vmatprep.subr.bf16.mxu1 %v589_v1  ;;  %v576_v4 = vld [vmem:[%s692_s3 + $0x10] sm:$0xff]   ;;  %s519_s11 = sshll.u32 %s698_s25, 3  ;;  %vm300_vm1 = vcmask 261120   ;;  %v577_v7 = vld [vmem:[%s692_s3 + $0x8] sm:$0xff]   ;;  %v578_v8 = vld [vmem:[%s692_s3] sm:$0xff]   ;;  %vm385_vm2 = vcmask 523264  }
   0xd   : > { %544 = vmatpush3.bf16.msra.mxu0 %v573_v0  ;;  %547 = vmatprep.mubr.msk.bf16.mxu0 %vm590_vm0, %v589_v1  ;;  %s269_s14 = scalar_lea.vmem %s689_s0, %s519_s11  ;;  %v521_v9 = vld [vmem:[%s691_s2] ss:$0 sm:$0xff]  ;;  %s273_s8 = scalar_lea.vmem %s696_s7, %s519_s11 }
   0xe   : > { %545 = vmatprep.subr.bf16.mxu0 %v589_v1  ;;  %559 = vmatprep.mubr.msk.bf16.mxu1 %vm590_vm0, %v589_v1  ;;  %v275_v5 = vld [vmem:[%s269_s14] sm:$0xff] }
   0xf   : > { %552 = vmatpush3.bf16.msra.mxu1 %v575_v3  ;;  %v276_v6 = vpack.c.bf16 %v275_v5, %v275_v5  ;;  %v525_v17 = vld [vmem:[%s693_s4] ss:$0 sm:$0xff] }
  0x10   : > { %553 = vmatprep.subr.bf16.mxu1 %v589_v1  ;;  %v531_v34 = vld [vmem:[%s694_s5] ss:$0 sm:$0xff] }
  0x11   : > { %546 = vmatpush3.bf16.msra.mxu0 %v574_v2  ;;  %v532_v36 = vld [vmem:[%s695_s6] ss:$0 sm:$0xff] }
  0x13   : > { %554 = vmatpush3.bf16.msra.mxu1 %v576_v4 }
  0x14   : > { %555 = vmatprep.subr.bf16.mxu1 %v589_v1  ;;  %548 = vmatmul.mubr.msk.bf16.vlgmr.msra.gmra.mxu0 %vm300_vm1, %v276_v6 }
  0x17   : > { %556 = vmatpush3.bf16.msra.mxu1 %v577_v7 }
  0x18   : > { %557 = vmatprep.subr.bf16.mxu1 %v589_v1 }
  0x1b   : > { %558 = vmatpush3.bf16.msra.mxu1 %v578_v8 }
  0xd4   : > { %v338_v10 = vpop.f32.mrf.mxu0 }
  0xd5   : > { %v339_v11 = vadd.f32 %v521_v9, %v338_v10 }
  0xd6   : > { %v549_v12 = vpop.f32.mrf.mxu0 }
  0xd7   : > { %v344_v13 = vmax.f32 %v339_v11, 0.0 }
  0xd8   : > { %v341_v14 = vpop.f32.mrf.mxu0 }
  0xd9   : > { %v345_v15 = vpack.c.bf16 %v344_v13, %v344_v13 }
  0xda   : > { %v550_v16 = vpop.f32.mrf.mxu0 }
  0xdb   : > { %560 = vmatmul.mubr.msk.bf16.vlgmr.msra.gmra.mxu1 %vm385_vm2, %v345_v15 }
 0x19b   : > { %v423_v18 = vpop.f32.mrf.mxu1 }
 0x19c   : > { %v424_v19 = vadd.f32 %v525_v17, %v423_v18 }
 0x19d   : > { %v561_v20 = vpop.f32.mrf.mxu1 }
 0x19e   : > { %v429_v21 = vadd.f32 %v424_v19, %v275_v5 }
 0x19f   : > { %v426_v22 = vpop.f32.mrf.mxu1 }
 0x1a0   : > { %v430_v23 = vsel %vm300_vm1, %v429_v21, 0.0 }
 0x1a1   : > { %431 = vadd.xlane.f32.xlu0 %v430_v23  ;;  %v562_v24 = vpop.f32.mrf.mxu1 }
 0x22a   : > { %v432_v25 = vpop.xlane.xlu0 %431 }
 0x22b   : > { %v434_v26 = vmul.f32 0.03125, %v432_v25 }
 0x22d   : > { %v435_v27 = vsub.f32 %v429_v21, %v434_v26 }
 0x22f   : > { %v436_v28 = vmul.f32 %v435_v27, %v435_v27 }
 0x231   : > { %v437_v29 = vsel %vm300_vm1, %v436_v28, 0.0 }
 0x232   : > { %438 = vadd.xlane.f32.xlu0 %v437_v29 }
 0x2bb   : > { %v439_v30 = vpop.xlane.xlu0 %438 }
 0x2bc   : > { %v440_v31 = vmul.f32 0.03125, %v439_v30 }
 0x2be   : > { %v441_v32 = vadd.f32 1e-05, %v440_v31 }
 0x2c0   : > { %579 = vrsqrt.f32 %v441_v32 }
 0x2cd   : > { %v580_v33 = vpop.eup %579 }
 0x2ce   : > { %v443_v35 = vmul.f32 %v580_v33, %v435_v27 }
 0x2d0   : > { %v451_v37 = vmul.f32 %v531_v34, %v443_v35 }
 0x2d2   : > { %v459_v38 = vadd.f32 %v532_v36, %v451_v37 }
 0x2d4   : > { %460 = vst.msk [vmem:[%s273_s8] sm:$0xff] %vm300_vm1, %v459_v38 }
 0x2d5 PF: > { %s17_s24 = sadd.s32 1, %s587_s24  }
 0x2d6   : > { %p14_p4 = scmp.ge.s32.totalorder %s17_s24, 4  }
 0x2d8   :  { %16 = sbr.rel (!%p14_p4) target bundleno = 1 (0x1), region = 78 }

// kernel: transformer_forward.11
= control target key start
LH: loop header
LB: loop body
LE: loop exit
PB: predicated region body
PF: predicated region fallthrough
CT: control target
= control target key end

     0   :  { %s1385_s13 = smov 0   ;;  %s1525_s0 = inlined_call_operand.vmem [shape: f32[2,8,32], index: 0, kind: input, shape index: {}, may-alias: {0,1}]   ;;  %s1526_s1 = inlined_call_operand.vmem [shape: f32[2,8,32], index: 1, kind: input, shape index: {}, may-alias: {0,1}]   ;;  %s1527_s2 = inlined_call_operand.vmem [shape: bf16[32,32], index: 2, kind: input, shape index: {}]   ;;  %s1528_s3 = inlined_call_operand.vmem [shape: f32[1,32], index: 3, kind: input, shape index: {}]   ;;  %s1529_s4 = inlined_call_operand.vmem [shape: bf16[32,64], index: 4, kind: input, shape index: {}]   ;;  %s1530_s5 = inlined_call_operand.vmem [shape: f32[1,64], index: 5, kind: input, shape index: {}]   ;;  %s1531_s6 = inlined_call_operand.vmem [shape: bf16[32,32], index: 6, kind: input, shape index: {}]   ;;  %s1532_s7 = inlined_call_operand.vmem [shape: f32[1,32], index: 7, kind: input, shape index: {}]   ;;  %s1533_s8 = inlined_call_operand.vmem [shape: f32[1,32], index: 8, kind: input, shape index: {}]   ;;  %s1534_s9 = inlined_call_operand.vmem [shape: f32[1,32], index: 9, kind: input, shape index: {}]   ;;  %s1535_s10 = inlined_call_operand.vmem [shape: f32[2,8,32], index: 10, kind: output, shape index: {}]  }
   0x1 LB: > { %s1137_s14 = sadd.s32 4294967295, %s1316_s13   ;;  %p1141_p0 = scmp.ge.s32.totalorder %s1316_s13, 1  ;;  %s1316_s13 = sphi %s1385_s13, %s20_s13  }
   0x2   : > { %p320_p1 = scmp.lt.s32.totalorder %s1316_s13, 3 }
   0x4   : > { %p321_p2 = pnand %p1141_p0, %p320_p1 }
   0x5   : > { %p360_p3 = scmp.lt.s32.totalorder (!%p321_p2), %s1137_s14, 1  ;;  %s1320_s15 = smov (!%p321_p2), 112  }
   0x6   : > { %324 = sbr.rel (%p321_p2) target bundleno = 1688 (0x698), region = 60  ;;  %s1321_s16 = smov (!%p321_p2), 120  }
   0x7   : > { %s1322_s17 = smov (!%p321_p2), 104   ;;  %s1323_s18 = smov (!%p321_p2), 96  }
   0x8   : > { %s1324_s19 = smov (!%p321_p2), 80   ;;  %s1325_s20 = smov (!%p321_p2), 72  }
   0x9   : > { %s1326_s21 = smov (!%p321_p2), 88   ;;  %s1327_s25 = smov (!%p321_p2), 8  }
   0xa   : > { %s1328_s28 = smov (!%p321_p2), 16  }
   0xb   : > { %v1286_v0 = vld [vmem:[%s1529_s4 + $0x8] sm:$0xff]   ;;  %v1318_v1 = vmov 0.0   ;;  %v1288_v3 = vld [vmem:[%s1529_s4] sm:$0xff]   ;;  %vm1319_vm0 = vmmov 0   ;;  %s1537_s14 = smov (!%p360_p3, %s1137_s14), 1  ;;  %vm399_vm1 = vcmask 261120  }
   0xc   : > { %1202 = vmatprep.subr.bf16.mxu1 %v1318_v1  ;;  %1194 = vmatprep.subr.bf16.mxu0 %v1318_v1  ;;  %v1287_v2 = vld [vmem:[%s1527_s2 + $0x8] sm:$0xff]   ;;  %v1289_v4 = vld [vmem:[%s1527_s2] sm:$0xff]   ;;  %s1413_s23 = sshll.u32 %s1537_s14, 3  ;;  %vm512_vm2 = vcmask 64512   ;;  %vm578_vm3 = vcmask 1043456   ;;  %vm969_vm4 = vcmask 130048  }
   0xd   : > { %1203 = vmatpush3.bf16.msra.mxu1 %v1286_v0  ;;  %1206 = vmatprep.mubr.msk.bf16.mxu1 %vm1319_vm0, %v1318_v1  ;;  %s367_s26 = scalar_lea.vmem %s1526_s1, %s1413_s23  ;;  %s363_s29 = scalar_lea.vmem %s1525_s0, %s1413_s23  ;;  %v1149_v9 = vld [vmem:[%s1530_s5] ss:$0 sm:$0xff]  ;;  %vm971_vm5 = vcmask 195584  }
   0xe   : > { %1195 = vmatpush3.bf16.msra.mxu0 %v1287_v2  ;;  %1204 = vmatprep.subr.bf16.mxu1 %v1318_v1  ;;  %v374_v5 = vld [vmem:[%s367_s26] sm:$0xff] }
   0xf   : > { %1196 = vmatprep.subr.bf16.mxu0 %v1318_v1  ;;  %1198 = vmatprep.mubr.msk.bf16.mxu0 %vm1319_vm0, %v1318_v1  ;;  %v443_v6 = vpack.c.bf16 %v374_v5, %v374_v5  ;;  %v1425_v7 = vld [vmem:[%s363_s29] sm:$0xff]  ;;  %s1329_s29 = smov 24  }
  0x10   : > { %v375_v8 = vpack.c.bf16 %v1425_v7, %v1425_v7  ;;  %v1145_v10 = vld [vmem:[%s1528_s3] ss:$0 sm:$0xff] }
  0x11   : > { %1205 = vmatpush3.bf16.msra.mxu1 %v1288_v3 }
  0x12   : > { %1197 = vmatpush3.bf16.msra.mxu0 %v1289_v4  ;;  %1216 = vmatprep.subr.bf16.mxu1 %v1318_v1 }
  0x13   : > { %1210 = vmatprep.subr.bf16.mxu0 %v1318_v1 }
  0x14   : > { %1207 = vmatmul.mubr.msk.bf16.vlgmr.msra.gmra.mxu1 %vm399_vm1, %v443_v6 }
  0x15   : > { %1199 = vmatmul.mubr.msk.bf16.vlgmr.msra.gmra.mxu0 %vm399_vm1, %v375_v8  ;;  %1218 = vmatprep.mubr.msk.bf16.mxu1 %vm1319_vm0, %v1318_v1 }
  0x16   : > { %1212 = vmatprep.mubr.msk.bf16.mxu0 %vm1319_vm0, %v1318_v1 }
  0xd4   : > { %v504_v11 = vpop.f32.mrf.mxu1 }
  0xd5   : > { %v505_v12 = vadd.f32 %v1149_v9, %v504_v11  ;;  %v437_v13 = vpop.f32.mrf.mxu0 }
  0xd6   : > { %v438_v14 = vadd.f32 %v1145_v10, %v437_v13  ;;  %v1208_v15 = vpop.f32.mrf.mxu1 }
  0xd7   : > { %v1441_v16 = vpack.c.bf16 %v505_v12, %v505_v12  ;;  %v1200_v17 = vpop.f32.mrf.mxu0 }
  0xd8   : > { %v507_v18 = vpop.f32.mrf.mxu1  ;;  %v510_v19 = vpack.c.bf16 %v438_v14, %v438_v14 }
  0xd9   : > { %736 = vrot.lane.b32.xlu1 %v1441_v16, %s1320_s15  ;;  %625 = vrot.lane.b32.xlu0 %v1441_v16, %s1321_s16  ;;  %v440_v20 = vpop.f32.mrf.mxu0  ;;  %v517_v21 = vsel %vm512_vm2, %v1441_v16, 0 }
  0xda   : > { %v1209_v22 = vpop.f32.mrf.mxu1  ;;  %1211 = vmatpush3.bf16.xpose.msra.mxu0 %v517_v21 }
  0xdb   : > { %v1201_v23 = vpop.f32.mrf.mxu0  ;;  %1222 = vmatprep.subr.bf16.mxu0 %v1318_v1 }
  0xdd   : > { %734 = vrot.lane.b32.xlu1 %v510_v19, %s1320_s15  ;;  %623 = vrot.lane.b32.xlu0 %v510_v19, %s1321_s16 }
  0xe1   : > { %845 = vrot.lane.b32.xlu1 %v510_v19, %s1322_s17  ;;  %847 = vrot.lane.b32.xlu0 %v1441_v16, %s1322_s17 }
  0xe2   : > { %1213 = vmatmul.mubr.msk.bf16.vlgmr.msra.gmra.mxu0 %vm512_vm2, %v510_v19 }
  0xe3   : > { %1224 = vmatprep.mubr.msk.bf16.mxu0 %vm1319_vm0, %v1318_v1 }
 0x14b   : > { %v626_v24 = vpop.permute.xlu0 %625  ;;  %v737_v26 = vpop.permute.xlu1 %736 }
 0x14c   : > { %v631_v25 = vsel %vm512_vm2, %v626_v24, 0  ;;  %v742_v28 = vsel %vm512_vm2, %v737_v26, 0 }
 0x14d   : > { %1223 = vmatpush3.bf16.xpose.msra.mxu0 %v631_v25 }
 0x14e   : > { %1234 = vmatprep.subr.bf16.mxu0 %v1318_v1 }
 0x14f   : > { %v624_v27 = vpop.permute.xlu0 %623  ;;  %v735_v30 = vpop.permute.xlu1 %734 }
 0x153   : > { %v848_v29 = vpop.permute.xlu0 %847  ;;  %v846_v32 = vpop.permute.xlu1 %845 }
 0x154   : > { %1225 = vmatmul.mubr.msk.bf16.vlgmr.msra.gmra.mxu0 %vm512_vm2, %v624_v27  ;;  %v853_v31 = vsel %vm512_vm2, %v848_v29, 0 }
 0x155   : > { %1235 = vmatpush3.bf16.xpose.msra.mxu0 %v742_v28  ;;  %1236 = vmatprep.mubr.msk.bf16.mxu0 %vm1319_vm0, %v1318_v1 }
 0x156   : > { %1246 = vmatprep.subr.bf16.mxu0 %v1318_v1 }
 0x15c   : > { %1237 = vmatmul.mubr.msk.bf16.vlgmr.msra.gmra.mxu0 %vm512_vm2, %v735_v30 }
 0x15d   : > { %1247 = vmatpush3.bf16.xpose.msra.mxu0 %v853_v31  ;;  %1248 = vmatprep.mubr.msk.bf16.mxu0 %vm1319_vm0, %v1318_v1 }
 0x15e   : > { %1258 = vmatprep.subr.bf16.mxu0 %v1318_v1 }
 0x164   : > { %1249 = vmatmul.mubr.msk.bf16.vlgmr.msra.gmra.mxu0 %vm512_vm2, %v846_v32 }
 0x165   : > { %1262 = vmatprep.mubr.msk.bf16.mxu0 %vm1319_vm0, %v1318_v1 }
 0x1a2   : > { %v553_v33 = vpop.f32.mrf.mxu0 }
 0x1a3   : > { %v559_v34 = vmul.f32 0.35355338, %v553_v33 }
 0x1a4   : > { %v1214_v35 = vpop.f32.mrf.mxu0 }
 0x1a5   : > { %v560_v36 = vsel %vm512_vm2, %v559_v34, -inf }
 0x1a6   : > { %561 = vmax.xlane.f32.xlu0 %v560_v36  ;;  %v556_v37 = vpop.f32.mrf.mxu0 }
 0x1a8   : > { %v1215_v38 = vpop.f32.mrf.mxu0 }
 0x214   : > { %v667_v39 = vpop.f32.mrf.mxu0 }
 0x215   : > { %v673_v40 = vmul.f32 0.35355338, %v667_v39 }
 0x216   : > { %v1226_v41 = vpop.f32.mrf.mxu0 }
 0x217   : > { %v674_v42 = vsel %vm512_vm2, %v673_v40, -inf }
 0x218   : > { %675 = vmax.xlane.f32.xlu1 %v674_v42  ;;  %v670_v43 = vpop.f32.mrf.mxu0 }
 0x219   : > { %v1290_v43 = vld [vmem:[%s1531_s6 + $0x8] sm:$0xff]  }
 0x21a   : > { %v1227_v44 = vpop.f32.mrf.mxu0  ;;  %1259 = vmatpush3.bf16.msra.mxu0 %v1290_v43 }
 0x21b   : > { %1260 = vmatprep.subr.bf16.mxu0 %v1318_v1 }
 0x21c   : > { %v778_v45 = vpop.f32.mrf.mxu0 }
 0x21d   : > { %v784_v46 = vmul.f32 0.35355338, %v778_v45 }
 0x21e   : > { %v1238_v47 = vpop.f32.mrf.mxu0 }
 0x21f   : > { %v785_v48 = vsel %vm512_vm2, %v784_v46, -inf }
 0x220   : > { %786 = vmax.xlane.f32.xlu0 %v785_v48  ;;  %v781_v49 = vpop.f32.mrf.mxu0 }
 0x222   : > { %v1239_v50 = vpop.f32.mrf.mxu0 }
 0x224   : > { %v889_v51 = vpop.f32.mrf.mxu0 }
 0x225   : > { %v895_v52 = vmul.f32 0.35355338, %v889_v51 }
 0x226   : > { %v1250_v53 = vpop.f32.mrf.mxu0 }
 0x227   : > { %v896_v54 = vsel %vm512_vm2, %v895_v52, -inf }
 0x228   : > { %897 = vmax.xlane.f32.xlu0 %v896_v54  ;;  %v892_v55 = vpop.f32.mrf.mxu0 }
 0x22a   : > { %v1251_v56 = vpop.f32.mrf.mxu0 }
 0x22f   : > { %v562_v57 = vpop.xlane.xlu0 %561 }
 0x230   : > { %v563_v58 = vsub.f32 %v559_v34, %v562_v57 }
 0x232   : > { %v564_v59 = vmul.f32 1.442695, %v563_v58 }
 0x234   : > { %1292 = vpow2.f32 %v564_v59 }
 0x241   : > { %v1293_v60 = vpop.eup %1292 }
 0x242   : > { %v566_v61 = vsel %vm512_vm2, %v1293_v60, 0.0 }
 0x243   : > { %567 = vadd.xlane.f32.xlu1 %v566_v61 }
 0x254   : > { %573 = vrot.lane.b32.xlu1 %v1441_v16, %s1323_s18 }
 0x2a1   : > { %v676_v62 = vpop.xlane.xlu1 %675 }
 0x2a2   : > { %v677_v63 = vsub.f32 %v673_v40, %v676_v62 }
 0x2a4   : > { %v678_v0 = vmul.f32 1.442695, %v677_v63  ;;  %v1161_v63 = vld [vmem:[%s1532_s7] ss:$0 sm:$0xff] }
 0x2a6   : > { %1294 = vpow2.f32 %v678_v0 }
 0x2a9   : > { %v787_v2 = vpop.xlane.xlu0 %786 }
 0x2aa   : > { %v788_v3 = vsub.f32 %v784_v46, %v787_v2  ;;  %v1291_v46 = vld [vmem:[%s1531_s6] sm:$0xff]  }
 0x2ab   : > { %1261 = vmatpush3.bf16.msra.mxu0 %v1291_v46 }
 0x2ac   : > { %v789_v4 = vmul.f32 1.442695, %v788_v3 }
 0x2ae   : > { %1296 = vpow2.f32 %v789_v4 }
 0x2b1   : > { %v898_v5 = vpop.xlane.xlu0 %897 }
 0x2b2   : > { %v899_v6 = vsub.f32 %v895_v52, %v898_v5 }
 0x2b3   : > { %v1295_v8 = vpop.eup %1294 }
 0x2b4   : > { %v900_v9 = vmul.f32 1.442695, %v899_v6  ;;  %v680_v10 = vsel %vm512_vm2, %v1295_v8, 0.0 }
 0x2b5   : > { %681 = vadd.xlane.f32.xlu0 %v680_v10 }
 0x2b6   : > { %1298 = vpow2.f32 %v900_v9 }
 0x2bb   : > { %v1297_v11 = vpop.eup %1296 }
 0x2bc   : > { %v791_v12 = vsel %vm512_vm2, %v1297_v11, 0.0 }
 0x2bd   : > { %792 = vadd.xlane.f32.xlu1 %v791_v12 }
 0x2c3   : > { %v1299_v13 = vpop.eup %1298 }
 0x2c4   : > { %v902_v14 = vsel %vm512_vm2, %v1299_v13, 0.0 }
 0x2c5   : > { %903 = vadd.xlane.f32.xlu0 %v902_v14 }
 0x2cc   : > { %v568_v15 = vpop.xlane.xlu1 %567 }
 0x2cd   : > { %1300 = vrcp.f32 %v568_v15 }
 0x2ce   : > { %797 = vrot.lane.b32.xlu1 %v1441_v16, %s1324_s19  ;;  %s371_s19 = scalar_lea.vmem %s1535_s10, %s1413_s23 }
 0x2d0   : > { %v574_v17 = vpop.permute.xlu1 %573 }
 0x2d1   : > { %v580_v18 = vsel %vm578_vm3, %v574_v17, 0 }
 0x2d2   : > { %1217 = vmatpush3.bf16.msra.mxu1 %v580_v18  ;;  %908 = vrot.lane.b32.xlu1 %v1441_v16, %s1325_s20 }
 0x2d3   : > { %1228 = vmatprep.subr.bf16.mxu1 %v1318_v1 }
 0x2da   : > { %v1301_v19 = vpop.eup %1300 }
 0x2db   : > { %686 = vrot.lane.b32.xlu0 %v1441_v16, %s1326_s21  ;;  %v570_v20 = vmul.f32 %v1301_v19, %v1293_v60 }
 0x2dd   : > { %v571_v21 = vpack.c.bf16 %v570_v20, %v570_v20  ;;  %v1166_v20 = vld [vmem:[%s1534_s9] ss:$0 sm:$0xff] }
 0x2df   : > { %1219 = vmatmul.mubr.msk.bf16.vlgmr.msra.gmra.mxu1 %vm512_vm2, %v571_v21 }
 0x2e0   : > { %1230 = vmatprep.mubr.msk.bf16.mxu1 %vm1319_vm0, %v1318_v1 }
 0x33e   : > { %v682_v22 = vpop.xlane.xlu0 %681 }
 0x33f   : > { %1302 = vrcp.f32 %v682_v22 }
 0x346   : > { %v793_v23 = vpop.xlane.xlu1 %792 }
 0x347   : > { %1304 = vrcp.f32 %v793_v23 }
 0x34a   : > { %v798_v29 = vpop.permute.xlu1 %797 }
 0x34b   : > { %v803_v31 = vsel %vm578_vm3, %v798_v29, 0 }
 0x34c   : > { %v1303_v24 = vpop.eup %1302 }
 0x34d   : > { %v684_v26 = vmul.f32 %v1303_v24, %v1295_v8 }
 0x34e   : > { %v904_v25 = vpop.xlane.xlu0 %903  ;;  %v909_v33 = vpop.permute.xlu1 %908 }
 0x34f   : > { %1306 = vrcp.f32 %v904_v25  ;;  %v685_v16 = vpack.c.bf16 %v684_v26, %v684_v26  ;;  %v914_v36 = vsel %vm578_vm3, %v909_v33, 0 }
 0x352   : > { %v687_v27 = vpop.permute.xlu0 %686 }
 0x353   : > { %v692_v28 = vsel %vm578_vm3, %v687_v27, 0 }
 0x354   : > { %1229 = vmatpush3.bf16.msra.mxu1 %v692_v28  ;;  %v1305_v30 = vpop.eup %1304 }
 0x355   : > { %1240 = vmatprep.subr.bf16.mxu1 %v1318_v1  ;;  %v795_v32 = vmul.f32 %v1305_v30, %v1297_v11 }
 0x357   : > { %1231 = vmatmul.mubr.msk.bf16.vlgmr.msra.gmra.mxu1 %vm512_vm2, %v685_v16  ;;  %v796_v34 = vpack.c.bf16 %v795_v32, %v795_v32 }
 0x358   : > { %1241 = vmatpush3.bf16.msra.mxu1 %v803_v31  ;;  %1242 = vmatprep.mubr.msk.bf16.mxu1 %vm1319_vm0, %v1318_v1 }
 0x359   : > { %1252 = vmatprep.subr.bf16.mxu1 %v1318_v1 }
 0x35c   : > { %v1307_v35 = vpop.eup %1306 }
 0x35d   : > { %v906_v37 = vmul.f32 %v1307_v35, %v1299_v13 }
 0x35f   : > { %1243 = vmatmul.mubr.msk.bf16.vlgmr.msra.gmra.mxu1 %vm512_vm2, %v796_v34  ;;  %v907_v38 = vpack.c.bf16 %v906_v37, %v906_v37 }
 0x360   : > { %1253 = vmatpush3.bf16.msra.mxu1 %v914_v36  ;;  %1254 = vmatprep.mubr.msk.bf16.mxu1 %vm1319_vm0, %v1318_v1 }
 0x367   : > { %1255 = vmatmul.mubr.msk.bf16.vlgmr.msra.gmra.mxu1 %vm512_vm2, %v907_v38 }
 0x39f   : > { %v616_v39 = vpop.f32.mrf.mxu1 }
 0x3a1   : > { %v1220_v40 = vpop.f32.mrf.mxu1 }
 0x3a3   : > { %v619_v41 = vpop.f32.mrf.mxu1 }
 0x3a5   : > { %v1221_v42 = vpop.f32.mrf.mxu1 }
 0x417   : > { %v728_v44 = vpop.f32.mrf.mxu1 }
 0x418   : > { %957 = vrot.lane.b32.xlu0 %v728_v44, %s1327_s25 }
 0x419   : > { %v1232_v45 = vpop.f32.mrf.mxu1 }
 0x41b   : > { %v731_v47 = vpop.f32.mrf.mxu1 }
 0x41d   : > { %v1233_v48 = vpop.f32.mrf.mxu1 }
 0x41f   : > { %v839_v49 = vpop.f32.mrf.mxu1 }
 0x420   : > { %961 = vrot.lane.b32.xlu1 %v839_v49, %s1328_s28 }
 0x421   : > { %v1244_v50 = vpop.f32.mrf.mxu1 }
 0x423   : > { %v842_v51 = vpop.f32.mrf.mxu1 }
 0x425   : > { %v1245_v52 = vpop.f32.mrf.mxu1 }
 0x427   : > { %v950_v53 = vpop.f32.mrf.mxu1 }
 0x428   : > { %965 = vrot.lane.b32.xlu0 %v950_v53, %s1329_s29 }
 0x429   : > { %v1256_v1 = vpop.f32.mrf.mxu1 }
 0x42b   : > { %v953_v54 = vpop.f32.mrf.mxu1 }
 0x42d   : > { %v1257_v55 = vpop.f32.mrf.mxu1 }
 0x48a   : > { %v958_v56 = vpop.permute.xlu0 %957 }
 0x48b   : > { %v968_v58 = vsel %vm512_vm2, %v616_v39, %v958_v56 }
 0x492   : > { %v962_v57 = vpop.permute.xlu1 %961 }
 0x493   : > { %v970_v59 = vsel %vm969_vm4, %v968_v58, %v962_v57 }
 0x49a   : > { %v966_v60 = vpop.permute.xlu0 %965 }
 0x49b   : > { %v972_v61 = vsel %vm971_vm5, %v970_v59, %v966_v60 }
 0x49c   : > { %v973_v62 = vpack.c.bf16 %v972_v61, %v972_v61 }
 0x49e   : > { %1263 = vmatmul.mubr.msk.bf16.vlgmr.msra.gmra.mxu0 %vm399_vm1, %v973_v62 }
 0x55e   : > { %v1034_v0 = vpop.f32.mrf.mxu0 }
 0x55f   : > { %v1035_v2 = vadd.f32 %v1161_v63, %v1034_v0 }
 0x560   : > { %v1264_v3 = vpop.f32.mrf.mxu0 }
 0x561   : > { %v1040_v4 = vadd.f32 %v1035_v2, %v1425_v7  ;;  %v1165_v7 = vld [vmem:[%s1533_s8] ss:$0 sm:$0xff] }
 0x562   : > { %v1037_v5 = vpop.f32.mrf.mxu0 }
 0x563   : > { %v1041_v6 = vsel %vm399_vm1, %v1040_v4, 0.0 }
 0x564   : > { %1042 = vadd.xlane.f32.xlu1 %v1041_v6  ;;  %v1265_v8 = vpop.f32.mrf.mxu0 }
 0x5ed   : > { %v1043_v9 = vpop.xlane.xlu1 %1042 }
 0x5ee   : > { %v1045_v10 = vmul.f32 0.03125, %v1043_v9 }
 0x5f0   : > { %v1046_v11 = vsub.f32 %v1040_v4, %v1045_v10 }
 0x5f2   : > { %v1047_v12 = vmul.f32 %v1046_v11, %v1046_v11 }
 0x5f4   : > { %v1048_v13 = vsel %vm399_vm1, %v1047_v12, 0.0 }
 0x5f5   : > { %1049 = vadd.xlane.f32.xlu0 %v1048_v13 }
 0x67e   : > { %v1050_v14 = vpop.xlane.xlu0 %1049 }
 0x67f   : > { %v1051_v15 = vmul.f32 0.03125, %v1050_v14 }
 0x681   : > { %v1052_v17 = vadd.f32 1e-05, %v1051_v15 }
 0x683   : > { %1308 = vrsqrt.f32 %v1052_v17 }
 0x690   : > { %v1309_v18 = vpop.eup %1308 }
 0x691   : > { %v1054_v19 = vmul.f32 %v1309_v18, %v1046_v11 }
 0x693   : > { %v1062_v21 = vmul.f32 %v1165_v7, %v1054_v19 }
 0x695   : > { %v1070_v22 = vadd.f32 %v1166_v20, %v1062_v21 }
 0x697   : > { %1071 = vst.msk [vmem:[%s371_s19] sm:$0xff] %vm399_vm1, %v1070_v22 }
 0x698 PF: > { %s20_s13 = sadd.s32 1, %s1316_s13  }
 0x699   : > { %p17_p4 = scmp.ge.s32.totalorder %s20_s13, 4  }
 0x69b   :  { %19 = sbr.rel (!%p17_p4) target bundleno = 1 (0x1), region = 93 }

// kernel: transformer_forward.15
= control target key start
LH: loop header
LB: loop body
LE: loop exit
PB: predicated region body
PF: predicated region fallthrough
CT: control target
= control target key end

     0   :  { %s1395_s13 = smov 0   ;;  %s1536_s0 = inlined_call_operand.vmem [shape: f32[2,8,32], index: 0, kind: input, shape index: {}, may-alias: {0,1}]   ;;  %s1537_s1 = inlined_call_operand.vmem [shape: f32[2,8,32], index: 1, kind: input, shape index: {}, may-alias: {0,1}]   ;;  %s1538_s2 = inlined_call_operand.vmem [shape: bf16[32,32], index: 2, kind: input, shape index: {}]   ;;  %s1539_s3 = inlined_call_operand.vmem [shape: f32[1,32], index: 3, kind: input, shape index: {}]   ;;  %s1540_s4 = inlined_call_operand.vmem [shape: bf16[32,64], index: 4, kind: input, shape index: {}]   ;;  %s1541_s5 = inlined_call_operand.vmem [shape: f32[1,64], index: 5, kind: input, shape index: {}]   ;;  %s1542_s6 = inlined_call_operand.vmem [shape: bf16[32,32], index: 6, kind: input, shape index: {}]   ;;  %s1543_s7 = inlined_call_operand.vmem [shape: f32[1,32], index: 7, kind: input, shape index: {}]   ;;  %s1544_s8 = inlined_call_operand.vmem [shape: f32[1,32], index: 8, kind: input, shape index: {}]   ;;  %s1545_s9 = inlined_call_operand.vmem [shape: f32[1,32], index: 9, kind: input, shape index: {}]   ;;  %s1546_s10 = inlined_call_operand.vmem [shape: f32[2,8,32], index: 10, kind: output, shape index: {}]  }
   0x1 LB: > { %s1147_s14 = sadd.s32 4294967295, %s1326_s13   ;;  %p1151_p0 = scmp.ge.s32.totalorder %s1326_s13, 1  ;;  %s1326_s13 = sphi %s1395_s13, %s20_s13  }
   0x2   : > { %p320_p1 = scmp.lt.s32.totalorder %s1326_s13, 3 }
   0x4   : > { %p321_p2 = pnand %p1151_p0, %p320_p1 }
   0x5   : > { %p360_p3 = scmp.lt.s32.totalorder (!%p321_p2), %s1147_s14, 1  ;;  %s1330_s15 = smov (!%p321_p2), 112  }
   0x6   : > { %324 = sbr.rel (%p321_p2) target bundleno = 1690 (0x69a), region = 60  ;;  %s1331_s16 = smov (!%p321_p2), 120  }
   0x7   : > { %s1332_s17 = smov (!%p321_p2), 104   ;;  %s1333_s18 = smov (!%p321_p2), 96  }
   0x8   : > { %s1334_s19 = smov (!%p321_p2), 80   ;;  %s1335_s20 = smov (!%p321_p2), 72  }
   0x9   : > { %s1336_s21 = smov (!%p321_p2), 88   ;;  %s1337_s25 = smov (!%p321_p2), 8  }
   0xa   : > { %s1338_s28 = smov (!%p321_p2), 16  }
   0xb   : > { %v1296_v0 = vld [vmem:[%s1540_s4 + $0x8] sm:$0xff]   ;;  %v1328_v1 = vmov 0.0   ;;  %v1298_v3 = vld [vmem:[%s1540_s4] sm:$0xff]   ;;  %vm1329_vm0 = vmmov 0   ;;  %s1548_s14 = smov (!%p360_p3, %s1147_s14), 1  ;;  %vm399_vm1 = vcmask 261120   ;;  %v510_v33 = vlaneseq }
   0xc   : > { %1212 = vmatprep.subr.bf16.mxu1 %v1328_v1  ;;  %1204 = vmatprep.subr.bf16.mxu0 %v1328_v1  ;;  %v1297_v2 = vld [vmem:[%s1538_s2 + $0x8] sm:$0xff]   ;;  %v1299_v4 = vld [vmem:[%s1538_s2] sm:$0xff]   ;;  %s1423_s23 = sshll.u32 %s1548_s14, 3  ;;  %vm518_vm2 = vcmask 64512   ;;  %vm585_vm4 = vcmask 1043456   ;;  %vm979_vm5 = vcmask 130048  }
   0xd   : > { %1213 = vmatpush3.bf16.msra.mxu1 %v1296_v0  ;;  %1216 = vmatprep.mubr.msk.bf16.mxu1 %vm1329_vm0, %v1328_v1  ;;  %s367_s26 = scalar_lea.vmem %s1537_s1, %s1423_s23  ;;  %s363_s29 = scalar_lea.vmem %s1536_s0, %s1423_s23  ;;  %v1159_v9 = vld [vmem:[%s1541_s5] ss:$0 sm:$0xff]  ;;  %v511_v34 = vshrl.u32 %v510_v33, 7  ;;  %v513_v35 = vand.u32 127, %v510_v33  ;;  %vm981_vm6 = vcmask 195584  }
   0xe   : > { %1205 = vmatpush3.bf16.msra.mxu0 %v1297_v2  ;;  %1214 = vmatprep.subr.bf16.mxu1 %v1328_v1  ;;  %v374_v5 = vld [vmem:[%s367_s26] sm:$0xff] }
   0xf   : > { %1206 = vmatprep.subr.bf16.mxu0 %v1328_v1  ;;  %1208 = vmatprep.mubr.msk.bf16.mxu0 %vm1329_vm0, %v1328_v1  ;;  %v443_v6 = vpack.c.bf16 %v374_v5, %v374_v5  ;;  %v1435_v7 = vld [vmem:[%s363_s29] sm:$0xff]  ;;  %vm514_vm3 = vcmp.gt.s32.totalorder %v513_v35, %v511_v34  ;;  %s1339_s29 = smov 24  }
  0x10   : > { %v375_v8 = vpack.c.bf16 %v1435_v7, %v1435_v7  ;;  %v1155_v10 = vld [vmem:[%s1539_s3] ss:$0 sm:$0xff]  ;;  %v515_v37 = vsel %vm514_vm3, -1e+09, %v1328_v1 }
  0x11   : > { %1215 = vmatpush3.bf16.msra.mxu1 %v1298_v3 }
  0x12   : > { %1207 = vmatpush3.bf16.msra.mxu0 %v1299_v4  ;;  %1226 = vmatprep.subr.bf16.mxu1 %v1328_v1 }
  0x13   : > { %1220 = vmatprep.subr.bf16.mxu0 %v1328_v1 }
  0x14   : > { %1217 = vmatmul.mubr.msk.bf16.vlgmr.msra.gmra.mxu1 %vm399_vm1, %v443_v6 }
  0x15   : > { %1209 = vmatmul.mubr.msk.bf16.vlgmr.msra.gmra.mxu0 %vm399_vm1, %v375_v8  ;;  %1228 = vmatprep.mubr.msk.bf16.mxu1 %vm1329_vm0, %v1328_v1 }
  0x16   : > { %1222 = vmatprep.mubr.msk.bf16.mxu0 %vm1329_vm0, %v1328_v1 }
  0xd4   : > { %v504_v11 = vpop.f32.mrf.mxu1 }
  0xd5   : > { %v505_v12 = vadd.f32 %v1159_v9, %v504_v11  ;;  %v437_v13 = vpop.f32.mrf.mxu0 }
  0xd6   : > { %v438_v14 = vadd.f32 %v1155_v10, %v437_v13  ;;  %v1218_v15 = vpop.f32.mrf.mxu1 }
  0xd7   : > { %v1451_v16 = vpack.c.bf16 %v505_v12, %v505_v12  ;;  %v1210_v17 = vpop.f32.mrf.mxu0 }
  0xd8   : > { %v507_v18 = vpop.f32.mrf.mxu1  ;;  %v516_v19 = vpack.c.bf16 %v438_v14, %v438_v14 }
  0xd9   : > { %744 = vrot.lane.b32.xlu1 %v1451_v16, %s1330_s15  ;;  %632 = vrot.lane.b32.xlu0 %v1451_v16, %s1331_s16  ;;  %v440_v20 = vpop.f32.mrf.mxu0  ;;  %v523_v21 = vsel %vm518_vm2, %v1451_v16, 0 }
  0xda   : > { %v1219_v22 = vpop.f32.mrf.mxu1  ;;  %1221 = vmatpush3.bf16.xpose.msra.mxu0 %v523_v21 }
  0xdb   : > { %v1211_v23 = vpop.f32.mrf.mxu0  ;;  %1232 = vmatprep.subr.bf16.mxu0 %v1328_v1 }
  0xdd   : > { %742 = vrot.lane.b32.xlu1 %v516_v19, %s1330_s15  ;;  %630 = vrot.lane.b32.xlu0 %v516_v19, %s1331_s16 }
  0xe1   : > { %854 = vrot.lane.b32.xlu1 %v516_v19, %s1332_s17  ;;  %856 = vrot.lane.b32.xlu0 %v1451_v16, %s1332_s17 }
  0xe2   : > { %1223 = vmatmul.mubr.msk.bf16.vlgmr.msra.gmra.mxu0 %vm518_vm2, %v516_v19 }
  0xe3   : > { %1234 = vmatprep.mubr.msk.bf16.mxu0 %vm1329_vm0, %v1328_v1 }
 0x14b   : > { %v633_v24 = vpop.permute.xlu0 %632  ;;  %v745_v26 = vpop.permute.xlu1 %744 }
 0x14c   : > { %v638_v25 = vsel %vm518_vm2, %v633_v24, 0  ;;  %v750_v28 = vsel %vm518_vm2, %v745_v26, 0 }
 0x14d   : > { %1233 = vmatpush3.bf16.xpose.msra.mxu0 %v638_v25 }
 0x14e   : > { %1244 = vmatprep.subr.bf16.mxu0 %v1328_v1 }
 0x14f   : > { %v631_v27 = vpop.permute.xlu0 %630  ;;  %v743_v30 = vpop.permute.xlu1 %742 }
 0x153   : > { %v857_v29 = vpop.permute.xlu0 %856  ;;  %v855_v32 = vpop.permute.xlu1 %854 }
 0x154   : > { %1235 = vmatmul.mubr.msk.bf16.vlgmr.msra.gmra.mxu0 %vm518_vm2, %v631_v27  ;;  %v862_v31 = vsel %vm518_vm2, %v857_v29, 0 }
 0x155   : > { %1245 = vmatpush3.bf16.xpose.msra.mxu0 %v750_v28  ;;  %1246 = vmatprep.mubr.msk.bf16.mxu0 %vm1329_vm0, %v1328_v1 }
 0x156   : > { %1256 = vmatprep.subr.bf16.mxu0 %v1328_v1 }
 0x15c   : > { %1247 = vmatmul.mubr.msk.bf16.vlgmr.msra.gmra.mxu0 %vm518_vm2, %v743_v30 }
 0x15d   : > { %1257 = vmatpush3.bf16.xpose.msra.mxu0 %v862_v31  ;;  %1258 = vmatprep.mubr.msk.bf16.mxu0 %vm1329_vm0, %v1328_v1 }
 0x15e   : > { %1268 = vmatprep.subr.bf16.mxu0 %v1328_v1 }
 0x164   : > { %1259 = vmatmul.mubr.msk.bf16.vlgmr.msra.gmra.mxu0 %vm518_vm2, %v855_v32 }
 0x165   : > { %1272 = vmatprep.mubr.msk.bf16.mxu0 %vm1329_vm0, %v1328_v1 }
 0x1a2   : > { %v559_v36 = vpop.f32.mrf.mxu0 }
 0x1a3   : > { %v565_v38 = vmul.f32 0.35355338, %v559_v36 }
 0x1a4   : > { %v1224_v39 = vpop.f32.mrf.mxu0 }
 0x1a5   : > { %v566_v40 = vadd.f32 %v565_v38, %v515_v37 }
 0x1a6   : > { %v562_v41 = vpop.f32.mrf.mxu0 }
 0x1a7   : > { %v567_v42 = vsel %vm518_vm2, %v566_v40, -inf }
 0x1a8   : > { %568 = vmax.xlane.f32.xlu0 %v567_v42  ;;  %v1225_v43 = vpop.f32.mrf.mxu0 }
 0x214   : > { %v674_v44 = vpop.f32.mrf.mxu0 }
 0x215   : > { %v680_v45 = vmul.f32 0.35355338, %v674_v44 }
 0x216   : > { %v1236_v46 = vpop.f32.mrf.mxu0 }
 0x217   : > { %v681_v47 = vadd.f32 %v680_v45, %v515_v37 }
 0x218   : > { %v677_v48 = vpop.f32.mrf.mxu0 }
 0x219   : > { %v682_v49 = vsel %vm518_vm2, %v681_v47, -inf }
 0x21a   : > { %683 = vmax.xlane.f32.xlu1 %v682_v49  ;;  %v1237_v50 = vpop.f32.mrf.mxu0 }
 0x21c   : > { %v786_v51 = vpop.f32.mrf.mxu0 }
 0x21d   : > { %v792_v52 = vmul.f32 0.35355338, %v786_v51  ;;  %v1300_v51 = vld [vmem:[%s1542_s6 + $0x8] sm:$0xff]  }
 0x21e   : > { %v1248_v53 = vpop.f32.mrf.mxu0  ;;  %1269 = vmatpush3.bf16.msra.mxu0 %v1300_v51 }
 0x21f   : > { %v793_v54 = vadd.f32 %v792_v52, %v515_v37  ;;  %1270 = vmatprep.subr.bf16.mxu0 %v1328_v1 }
 0x220   : > { %v789_v55 = vpop.f32.mrf.mxu0 }
 0x221   : > { %v794_v56 = vsel %vm518_vm2, %v793_v54, -inf }
 0x222   : > { %795 = vmax.xlane.f32.xlu0 %v794_v56  ;;  %v1249_v57 = vpop.f32.mrf.mxu0 }
 0x224   : > { %v898_v58 = vpop.f32.mrf.mxu0 }
 0x225   : > { %v904_v59 = vmul.f32 0.35355338, %v898_v58 }
 0x226   : > { %v1260_v60 = vpop.f32.mrf.mxu0 }
 0x227   : > { %v905_v61 = vadd.f32 %v904_v59, %v515_v37 }
 0x228   : > { %v901_v62 = vpop.f32.mrf.mxu0 }
 0x229   : > { %v906_v63 = vsel %vm518_vm2, %v905_v61, -inf }
 0x22a   : > { %907 = vmax.xlane.f32.xlu0 %v906_v63  ;;  %v1261_v0 = vpop.f32.mrf.mxu0 }
 0x231   : > { %v569_v2 = vpop.xlane.xlu0 %568 }
 0x232   : > { %v570_v3 = vsub.f32 %v566_v40, %v569_v2 }
 0x234   : > { %v571_v4 = vmul.f32 1.442695, %v570_v3 }
 0x236   : > { %1302 = vpow2.f32 %v571_v4 }
 0x243   : > { %v1303_v5 = vpop.eup %1302 }
 0x244   : > { %v573_v6 = vsel %vm518_vm2, %v1303_v5, 0.0 }
 0x245   : > { %574 = vadd.xlane.f32.xlu1 %v573_v6 }
 0x256   : > { %580 = vrot.lane.b32.xlu1 %v1451_v16, %s1333_s18 }
 0x2a3   : > { %v684_v8 = vpop.xlane.xlu1 %683 }
 0x2a4   : > { %v685_v9 = vsub.f32 %v681_v47, %v684_v8 }
 0x2a6   : > { %v686_v10 = vmul.f32 1.442695, %v685_v9  ;;  %v1171_v9 = vld [vmem:[%s1543_s7] ss:$0 sm:$0xff] }
 0x2a8   : > { %1304 = vpow2.f32 %v686_v10 }
 0x2ab   : > { %v796_v11 = vpop.xlane.xlu0 %795 }
 0x2ac   : > { %v797_v12 = vsub.f32 %v793_v54, %v796_v11  ;;  %v1301_v54 = vld [vmem:[%s1542_s6] sm:$0xff]  }
 0x2ad   : > { %1271 = vmatpush3.bf16.msra.mxu0 %v1301_v54 }
 0x2ae   : > { %v798_v13 = vmul.f32 1.442695, %v797_v12 }
 0x2b0   : > { %1306 = vpow2.f32 %v798_v13 }
 0x2b3   : > { %v908_v14 = vpop.xlane.xlu0 %907 }
 0x2b4   : > { %v909_v15 = vsub.f32 %v905_v61, %v908_v14 }
 0x2b5   : > { %v1305_v17 = vpop.eup %1304 }
 0x2b6   : > { %v910_v18 = vmul.f32 1.442695, %v909_v15  ;;  %v688_v19 = vsel %vm518_vm2, %v1305_v17, 0.0 }
 0x2b7   : > { %689 = vadd.xlane.f32.xlu0 %v688_v19 }
 0x2b8   : > { %1308 = vpow2.f32 %v910_v18 }
 0x2bd   : > { %v1307_v20 = vpop.eup %1306 }
 0x2be   : > { %v800_v21 = vsel %vm518_vm2, %v1307_v20, 0.0 }
 0x2bf   : > { %801 = vadd.xlane.f32.xlu1 %v800_v21 }
 0x2c5   : > { %v1309_v22 = vpop.eup %1308 }
 0x2c6   : > { %v912_v23 = vsel %vm518_vm2, %v1309_v22, 0.0 }
 0x2c7   : > { %913 = vadd.xlane.f32.xlu0 %v912_v23 }
 0x2ce   : > { %v575_v24 = vpop.xlane.xlu1 %574 }
 0x2cf   : > { %1310 = vrcp.f32 %v575_v24 }
 0x2d0   : > { %806 = vrot.lane.b32.xlu1 %v1451_v16, %s1334_s19  ;;  %s371_s19 = scalar_lea.vmem %s1546_s10, %s1423_s23 }
 0x2d2   : > { %v581_v25 = vpop.permute.xlu1 %580 }
 0x2d3   : > { %v587_v26 = vsel %vm585_vm4, %v581_v25, 0 }
 0x2d4   : > { %1227 = vmatpush3.bf16.msra.mxu1 %v587_v26  ;;  %918 = vrot.lane.b32.xlu1 %v1451_v16, %s1335_s20 }
 0x2d5   : > { %1238 = vmatprep.subr.bf16.mxu1 %v1328_v1 }
 0x2dc   : > { %v1311_v27 = vpop.eup %1310 }
 0x2dd   : > { %694 = vrot.lane.b32.xlu0 %v1451_v16, %s1336_s21  ;;  %v577_v28 = vmul.f32 %v1311_v27, %v1303_v5 }
 0x2df   : > { %v578_v29 = vpack.c.bf16 %v577_v28, %v577_v28  ;;  %v1176_v28 = vld [vmem:[%s1545_s9] ss:$0 sm:$0xff] }
 0x2e1   : > { %1229 = vmatmul.mubr.msk.bf16.vlgmr.msra.gmra.mxu1 %vm518_vm2, %v578_v29 }
 0x2e2   : > { %1240 = vmatprep.mubr.msk.bf16.mxu1 %vm1329_vm0, %v1328_v1 }
 0x340   : > { %v690_v30 = vpop.xlane.xlu0 %689 }
 0x341   : > { %1312 = vrcp.f32 %v690_v30 }
 0x348   : > { %v802_v31 = vpop.xlane.xlu1 %801 }
 0x349   : > { %1314 = vrcp.f32 %v802_v31 }
 0x34c   : > { %v807_v37 = vpop.permute.xlu1 %806 }
 0x34d   : > { %v812_v39 = vsel %vm585_vm4, %v807_v37, 0 }
 0x34e   : > { %v1313_v32 = vpop.eup %1312 }
 0x34f   : > { %v692_v34 = vmul.f32 %v1313_v32, %v1305_v17 }
 0x350   : > { %v914_v33 = vpop.xlane.xlu0 %913  ;;  %v919_v41 = vpop.permute.xlu1 %918 }
 0x351   : > { %1316 = vrcp.f32 %v914_v33  ;;  %v693_v16 = vpack.c.bf16 %v692_v34, %v692_v34  ;;  %v924_v44 = vsel %vm585_vm4, %v919_v41, 0 }
 0x354   : > { %v695_v35 = vpop.permute.xlu0 %694 }
 0x355   : > { %v700_v36 = vsel %vm585_vm4, %v695_v35, 0 }
 0x356   : > { %1239 = vmatpush3.bf16.msra.mxu1 %v700_v36  ;;  %v1315_v38 = vpop.eup %1314 }
 0x357   : > { %1250 = vmatprep.subr.bf16.mxu1 %v1328_v1  ;;  %v804_v40 = vmul.f32 %v1315_v38, %v1307_v20 }
 0x359   : > { %1241 = vmatmul.mubr.msk.bf16.vlgmr.msra.gmra.mxu1 %vm518_vm2, %v693_v16  ;;  %v805_v42 = vpack.c.bf16 %v804_v40, %v804_v40 }
 0x35a   : > { %1251 = vmatpush3.bf16.msra.mxu1 %v812_v39  ;;  %1252 = vmatprep.mubr.msk.bf16.mxu1 %vm1329_vm0, %v1328_v1 }
 0x35b   : > { %1262 = vmatprep.subr.bf16.mxu1 %v1328_v1 }
 0x35e   : > { %v1317_v43 = vpop.eup %1316 }
 0x35f   : > { %v916_v45 = vmul.f32 %v1317_v43, %v1309_v22 }
 0x361   : > { %1253 = vmatmul.mubr.msk.bf16.vlgmr.msra.gmra.mxu1 %vm518_vm2, %v805_v42  ;;  %v917_v46 = vpack.c.bf16 %v916_v45, %v916_v45 }
 0x362   : > { %1263 = vmatpush3.bf16.msra.mxu1 %v924_v44  ;;  %1264 = vmatprep.mubr.msk.bf16.mxu1 %vm1329_vm0, %v1328_v1 }
 0x369   : > { %1265 = vmatmul.mubr.msk.bf16.vlgmr.msra.gmra.mxu1 %vm518_vm2, %v917_v46 }
 0x3a1   : > { %v623_v47 = vpop.f32.mrf.mxu1 }
 0x3a3   : > { %v1230_v48 = vpop.f32.mrf.mxu1 }
 0x3a5   : > { %v626_v49 = vpop.f32.mrf.mxu1 }
 0x3a7   : > { %v1231_v50 = vpop.f32.mrf.mxu1 }
 0x419   : > { %v736_v52 = vpop.f32.mrf.mxu1 }
 0x41a   : > { %967 = vrot.lane.b32.xlu0 %v736_v52, %s1337_s25 }
 0x41b   : > { %v1242_v53 = vpop.f32.mrf.mxu1 }
 0x41d   : > { %v739_v55 = vpop.f32.mrf.mxu1 }
 0x41f   : > { %v1243_v56 = vpop.f32.mrf.mxu1 }
 0x421   : > { %v848_v57 = vpop.f32.mrf.mxu1 }
 0x422   : > { %971 = vrot.lane.b32.xlu1 %v848_v57, %s1338_s28 }
 0x423   : > { %v1254_v58 = vpop.f32.mrf.mxu1 }
 0x425   : > { %v851_v59 = vpop.f32.mrf.mxu1 }
 0x427   : > { %v1255_v60 = vpop.f32.mrf.mxu1 }
 0x429   : > { %v960_v61 = vpop.f32.mrf.mxu1 }
 0x42a   : > { %975 = vrot.lane.b32.xlu0 %v960_v61, %s1339_s29 }
 0x42b   : > { %v1266_v1 = vpop.f32.mrf.mxu1 }
 0x42d   : > { %v963_v62 = vpop.f32.mrf.mxu1 }
 0x42f   : > { %v1267_v63 = vpop.f32.mrf.mxu1 }
 0x48c   : > { %v968_v0 = vpop.permute.xlu0 %967 }
 0x48d   : > { %v978_v3 = vsel %vm518_vm2, %v623_v47, %v968_v0 }
 0x494   : > { %v972_v2 = vpop.permute.xlu1 %971 }
 0x495   : > { %v980_v4 = vsel %vm979_vm5, %v978_v3, %v972_v2 }
 0x49c   : > { %v976_v5 = vpop.permute.xlu0 %975 }
 0x49d   : > { %v982_v6 = vsel %vm981_vm6, %v980_v4, %v976_v5 }
 0x49e   : > { %v983_v8 = vpack.c.bf16 %v982_v6, %v982_v6 }
 0x4a0   : > { %1273 = vmatmul.mubr.msk.bf16.vlgmr.msra.gmra.mxu0 %vm399_vm1, %v983_v8 }
 0x560   : > { %v1044_v10 = vpop.f32.mrf.mxu0 }
 0x561   : > { %v1045_v11 = vadd.f32 %v1171_v9, %v1044_v10 }
 0x562   : > { %v1274_v12 = vpop.f32.mrf.mxu0 }
 0x563   : > { %v1050_v13 = vadd.f32 %v1045_v11, %v1435_v7  ;;  %v1175_v7 = vld [vmem:[%s1544_s8] ss:$0 sm:$0xff] }
 0x564   : > { %v1047_v14 = vpop.f32.mrf.mxu0 }
 0x565   : > { %v1051_v15 = vsel %vm399_vm1, %v1050_v13, 0.0 }
 0x566   : > { %1052 = vadd.xlane.f32.xlu1 %v1051_v15  ;;  %v1275_v17 = vpop.f32.mrf.mxu0 }
 0x5ef   : > { %v1053_v18 = vpop.xlane.xlu1 %1052 }
 0x5f0   : > { %v1055_v19 = vmul.f32 0.03125, %v1053_v18 }
 0x5f2   : > { %v1056_v20 = vsub.f32 %v1050_v13, %v1055_v19 }
 0x5f4   : > { %v1057_v21 = vmul.f32 %v1056_v20, %v1056_v20 }
 0x5f6   : > { %v1058_v22 = vsel %vm399_vm1, %v1057_v21, 0.0 }
 0x5f7   : > { %1059 = vadd.xlane.f32.xlu0 %v1058_v22 }
 0x680   : > { %v1060_v23 = vpop.xlane.xlu0 %1059 }
 0x681   : > { %v1061_v24 = vmul.f32 0.03125, %v1060_v23 }
 0x683   : > { %v1062_v25 = vadd.f32 1e-05, %v1061_v24 }
 0x685   : > { %1318 = vrsqrt.f32 %v1062_v25 }
 0x692   : > { %v1319_v26 = vpop.eup %1318 }
 0x693   : > { %v1064_v27 = vmul.f32 %v1319_v26, %v1056_v20 }
 0x695   : > { %v1072_v29 = vmul.f32 %v1175_v7, %v1064_v27 }
 0x697   : > { %v1080_v30 = vadd.f32 %v1176_v28, %v1072_v29 }
 0x699   : > { %1081 = vst.msk [vmem:[%s371_s19] sm:$0xff] %vm399_vm1, %v1080_v30 }
 0x69a PF: > { %s20_s13 = sadd.s32 1, %s1326_s13  }
 0x69b   : > { %p17_p4 = scmp.ge.s32.totalorder %s20_s13, 4  }
 0x69d   :  { %19 = sbr.rel (!%p17_p4) target bundleno = 1 (0x1), region = 93 }

</bundles_post_ra>
